<compile_context>
chip_gen: v7x
topology: tpu7x:2x2x1
jax: 0.10.0
libtpu: 0.0.40
codegen_flags: <defaults>
</compile_context>

<pallas_src>
import jax
import jax.numpy as jnp
from jax.experimental import pallas as pl
from jax.experimental.pallas import tpu as pltpu


def _make_block_kernel(bb, ho, wo, cin, cout, eps=1e-3):
    """Fused LeakyReLU -> 4x4/s2 conv -> InstanceNorm3d(1); bb samples per grid step."""
    hw = ho * wo
    inv_cnt = 1.0 / float(hw * cout)

    def kernel(x_ref, w_ref, g_ref, b_ref, o_ref, lhs_ref):
        # x_ref  : (bb, 4, wh, hh, cin) bf16  - (row,col)-parity planes, W-major spatial
        # w_ref  : (16*cin, cout) bf16        - tap-major K-folded HWIO conv weights
        # g_ref, b_ref : (1, 1) f32 in SMEM   - InstanceNorm affine scalars
        # o_ref  : (bb, ho, wo*cout) f32      - lane-dense NHWC rows (128 lanes at demo shape)
        # lhs_ref: (bb, wo, ho, 16*cin) bf16 VMEM scratch - K-folded conv LHS
        x = x_ref[...]
        a = jnp.where(x > 0, x, x * jnp.asarray(0.2, x.dtype))   # LeakyReLU, single bf16 pass

        # Assemble the K-folded LHS in VMEM (no HBM im2col): tap (kh,kw) of the
        # 4x4/s2 conv reads parity plane 2*(kh%2)+(kw%2) shifted by (kh//2, kw//2).
        for kh in range(4):
            p, dh = kh % 2, kh // 2
            ah = a[:, 2 * p:2 * p + 2, :, dh:dh + ho, :]          # sublane shift once per kh
            for kw in range(4):
                q, dw = kw % 2, kw // 2
                t = kh * 4 + kw
                lhs_ref[:, :, :, t * cin:(t + 1) * cin] = ah[:, q, dw:dw + wo, :, :]

        # ONE MXU matmul, K = 16*cin, f32 accumulation (vs. 16 tiny K=cin dots).
        lhs = lhs_ref[...].reshape(bb * hw, 16 * cin)
        acc = jnp.dot(lhs, w_ref[...], preferred_element_type=jnp.float32)

        # InstanceNorm3d(1): per-sample stats over (C,H,W), single pass (E[x], E[x^2]).
        z = acc.reshape(bb, hw, cout)                             # rows are j-major: (j*ho + i)
        s1 = jnp.sum(z, axis=(1, 2), keepdims=True)
        s2 = jnp.sum(z * z, axis=(1, 2), keepdims=True)
        mean = s1 * inv_cnt
        var = s2 * inv_cnt - mean * mean
        scale = jax.lax.rsqrt(var + eps) * g_ref[0, 0]
        shift = b_ref[0, 0] - mean * scale
        y = z * scale + shift

        # Lane-dense store: regroup (wo*ho, cout) rows into (ho, wo*cout) lanes via
        # wo aligned sublane slices (offsets j*ho) written at lane offsets j*cout.
        for j in range(wo):
            o_ref[:, :, j * cout:(j + 1) * cout] = (
                y[:, j * ho:(j + 1) * ho, :].astype(o_ref.dtype))

    return kernel


def _pick_batch_block(n, ho, wo):
    """Samples per grid step: stack along the matmul M dim (amortize per-step overhead
    and the MXU weight push on single-TC v5e/v6e) while keeping >= 2 grid steps when
    possible so a 2-TC chip (v7x) can split the batch across cores."""
    target = max(1, 512 // max(1, ho * wo))          # aim for ~512 LHS rows per step
    cap = max(1, min(target, n // 2)) if n > 1 else 1
    bb = 1
    for d in range(1, n + 1):
        if n % d == 0 and d <= cap:
            bb = d
    return bb


def block_forward(x_nchw, w_hwio, gamma, beta):
    """Block forward (default flags) on NCHW input; conv weights in HWIO (4,4,Cin,Cout)."""
    n, cin, h, w = x_nchw.shape
    kh_, kw_, wcin, cout = w_hwio.shape
    assert (kh_, kw_) == (4, 4) and wcin == cin and h % 2 == 0 and w % 2 == 0
    ho, wo = h // 2, w // 2
    hh, wh = ho + 1, wo + 1
    bb = _pick_batch_block(n, ho, wo)

    # NCHW -> NHWC, cast to bf16 (halves HBM read bytes), zero-pad by 1 and split into
    # (row-parity, col-parity) planes laid out W-major, so the conv's kw shifts hit a
    # leading dim in-kernel and the output regroups into lane-dense (ho, wo*cout) rows.
    x = jnp.transpose(x_nchw, (0, 2, 3, 1)).astype(jnp.bfloat16)
    xp = jnp.pad(x, ((0, 0), (1, 1), (1, 1), (0, 0)))                   # (n, 2*hh, 2*wh, cin)
    xq = jnp.transpose(xp.reshape(n, hh, 2, wh, 2, cin), (0, 2, 4, 3, 1, 5))
    xq = xq.reshape(n, 4, wh, hh, cin)                                  # plane = 2*(kh%2)+(kw%2)

    w_folded = w_hwio.reshape(16 * cin, cout).astype(jnp.bfloat16)      # tap-major K-folded weights
    g = jnp.asarray(gamma, jnp.float32).reshape(1, 1)
    b = jnp.asarray(beta, jnp.float32).reshape(1, 1)

    flops = 2 * n * ho * wo * (16 * cin) * cout
    bytes_accessed = xq.size * 2 + w_folded.size * 2 + n * ho * wo * cout * 4

    out = pl.pallas_call(
        _make_block_kernel(bb, ho, wo, cin, cout),
        out_shape=jax.ShapeDtypeStruct((n, ho, wo * cout), jnp.float32),
        grid=(n // bb,),
        in_specs=[
            pl.BlockSpec((bb, 4, wh, hh, cin), lambda i: (i, 0, 0, 0, 0)),
            pl.BlockSpec((16 * cin, cout), lambda i: (0, 0)),
            pl.BlockSpec(memory_space=pltpu.MemorySpace.SMEM),
            pl.BlockSpec(memory_space=pltpu.MemorySpace.SMEM),
        ],
        out_specs=pl.BlockSpec((bb, ho, wo * cout), lambda i: (i, 0, 0)),
        scratch_shapes=[pltpu.VMEM((bb, wo, ho, 16 * cin), jnp.bfloat16)],
        compiler_params=pltpu.CompilerParams(dimension_semantics=("parallel",)),
        cost_estimate=pl.CostEstimate(flops=flops, transcendentals=n,
                                      bytes_accessed=bytes_accessed),
    )(xq, w_folded, g, b)

    # Lane-dense kernel output (n, ho, wo*cout) -> NCHW (only the interface transpose left).
    return jnp.transpose(out.reshape(n, ho, wo, cout), (0, 3, 1, 2))


def _ref_forward(x_nchw, w_hwio, gamma, beta):
    # Pure-JAX (f32, lax.conv) reference for correctness checking.
    x = jnp.transpose(x_nchw, (0, 2, 3, 1)).astype(jnp.float32)
    a = jnp.where(x > 0, x, 0.2 * x)
    z = jax.lax.conv_general_dilated(
        a, w_hwio.astype(jnp.float32), (2, 2), ((1, 1), (1, 1)),
        dimension_numbers=("NHWC", "HWIO", "NHWC"))
    mean = jnp.mean(z, axis=(1, 2, 3), keepdims=True)
    var = jnp.mean(jnp.square(z - mean), axis=(1, 2, 3), keepdims=True)
    y = (z - mean) * jax.lax.rsqrt(var + 1e-3) * jnp.float32(gamma) + jnp.float32(beta)
    return jnp.transpose(y, (0, 3, 1, 2))


if __name__ == "__main__":
    key = jax.random.PRNGKey(0)
    kx, kw = jax.random.split(key)
    batch, input_nc, output_nc, spatial = 2, 4, 16, 16

    x = jax.random.normal(kx, (batch, input_nc, spatial, spatial), jnp.float32)
    w = 0.1 * jax.random.normal(kw, (4, 4, input_nc, output_nc), jnp.float32)
    gamma, beta = 1.25, 0.1            # InstanceNorm3d affine parameters (scalars)

    fwd = jax.jit(block_forward)
    out = jax.block_until_ready(fwd(x, w, gamma, beta))
    assert out.shape == (batch, output_nc, spatial // 2, spatial // 2), out.shape

    ref = _ref_forward(x, w, gamma, beta)
    err = float(jnp.max(jnp.abs(out - ref)))
    # bf16 MXU operands vs f32 reference -> ~1e-2-level gap is expected.
    assert jnp.allclose(out, ref, atol=3e-2, rtol=3e-2), err

    print("KERNEL_OK")
</pallas_src>

<mosaic_0001>
module attributes {stable_mosaic.version = 11 : i64} {
  func.func @kernel(%arg0: i32, %arg1: memref<1x4x9x9x4xbf16, #tpu.memory_space<vmem>>, %arg2: memref<64x16xbf16, #tpu.memory_space<vmem>>, %arg3: memref<1x1xf32, #tpu.memory_space<smem>>, %arg4: memref<1x1xf32, #tpu.memory_space<smem>>, %arg5: memref<1x8x128xf32, #tpu.memory_space<vmem>>, %arg6: memref<1x8x8x64xbf16, #tpu.memory_space<vmem>>) attributes {dimension_semantics = [#tpu.dimension_semantics<parallel>], iteration_bounds = array<i64: 2>, scalar_prefetch = 0 : i64, scratch_operands = 1 : i64, tpu.core_type = #tpu.core_type<tc>, window_params = [{transform_indices = @transform_0, window_bounds = array<i64: 1, 4, 9, 9, 4>}, {pipeline_mode = #tpu.pipeline_mode<synchronous>, transform_indices = @transform_1, window_bounds = array<i64: 64, 16>}, {transform_indices = @transform_2, window_bounds = array<i64: 1, 1>}, {transform_indices = @transform_3, window_bounds = array<i64: 1, 1>}, {transform_indices = @transform_4, window_bounds = array<i64: 1, 8, 128>}]} {
    %c0 = arith.constant 0 : index
    %c0_0 = arith.constant 0 : index
    %c0_1 = arith.constant 0 : index
    %c0_2 = arith.constant 0 : index
    %c0_3 = arith.constant 0 : index
    %0 = vector.load %arg1[%c0, %c0_0, %c0_1, %c0_2, %c0_3] : memref<1x4x9x9x4xbf16, #tpu.memory_space<vmem>>, vector<1x4x9x9x4xbf16>
    %cst = arith.constant 0.000000e+00 : bf16
    %1 = vector.broadcast %cst : bf16 to vector<1x4x9x9x4xbf16>
    %2 = arith.cmpf ogt, %0, %1 : vector<1x4x9x9x4xbf16>
    %cst_4 = arith.constant 2.001950e-01 : bf16
    %3 = vector.broadcast %cst_4 : bf16 to vector<1x4x9x9x4xbf16>
    %4 = arith.mulf %0, %3 : vector<1x4x9x9x4xbf16>
    %5 = arith.select %2, %0, %4 : vector<1x4x9x9x4xi1>, vector<1x4x9x9x4xbf16>
    %6 = vector.extract_strided_slice %5 {offsets = [0, 0, 0, 0, 0], sizes = [1, 2, 9, 8, 4], strides = [1, 1, 1, 1, 1]} : vector<1x4x9x9x4xbf16> to vector<1x2x9x8x4xbf16>
    %7 = vector.extract_strided_slice %6 {offsets = [0, 0, 0, 0, 0], sizes = [1, 1, 8, 8, 4], strides = [1, 1, 1, 1, 1]} : vector<1x2x9x8x4xbf16> to vector<1x1x8x8x4xbf16>
    %8 = vector.shape_cast %7 : vector<1x1x8x8x4xbf16> to vector<1x8x8x4xbf16>
    %c0_5 = arith.constant 0 : index
    %c0_6 = arith.constant 0 : index
    %c0_7 = arith.constant 0 : index
    %c0_8 = arith.constant 0 : index
    %9 = vector.load %arg6[%c0_5, %c0_6, %c0_7, %c0_8] : memref<1x8x8x64xbf16, #tpu.memory_space<vmem>>, vector<1x8x8x4xbf16>
    tpu.vector_store %arg6[%c0_5, %c0_6, %c0_7, %c0_8], %8 {strides = array<i32>} : memref<1x8x8x64xbf16, #tpu.memory_space<vmem>>, vector<1x8x8x4xbf16>,
    %10 = vector.extract_strided_slice %6 {offsets = [0, 1, 0, 0, 0], sizes = [1, 1, 8, 8, 4], strides = [1, 1, 1, 1, 1]} : vector<1x2x9x8x4xbf16> to vector<1x1x8x8x4xbf16>
    %11 = vector.shape_cast %10 : vector<1x1x8x8x4xbf16> to vector<1x8x8x4xbf16>
    %c0_9 = arith.constant 0 : index
    %c0_10 = arith.constant 0 : index
    %c0_11 = arith.constant 0 : index
    %c4 = arith.constant 4 : index
    %12 = vector.load %arg6[%c0_9, %c0_10, %c0_11, %c4] : memref<1x8x8x64xbf16, #tpu.memory_space<vmem>>, vector<1x8x8x4xbf16>
    tpu.vector_store %arg6[%c0_9, %c0_10, %c0_11, %c4], %11 {strides = array<i32>} : memref<1x8x8x64xbf16, #tpu.memory_space<vmem>>, vector<1x8x8x4xbf16>,
    %13 = vector.extract_strided_slice %6 {offsets = [0, 0, 1, 0, 0], sizes = [1, 1, 8, 8, 4], strides = [1, 1, 1, 1, 1]} : vector<1x2x9x8x4xbf16> to vector<1x1x8x8x4xbf16>
    %14 = vector.shape_cast %13 : vector<1x1x8x8x4xbf16> to vector<1x8x8x4xbf16>
    %c0_12 = arith.constant 0 : index
    %c0_13 = arith.constant 0 : index
    %c0_14 = arith.constant 0 : index
    %c8 = arith.constant 8 : index
    %15 = vector.load %arg6[%c0_12, %c0_13, %c0_14, %c8] : memref<1x8x8x64xbf16, #tpu.memory_space<vmem>>, vector<1x8x8x4xbf16>
    tpu.vector_store %arg6[%c0_12, %c0_13, %c0_14, %c8], %14 {strides = array<i32>} : memref<1x8x8x64xbf16, #tpu.memory_space<vmem>>, vector<1x8x8x4xbf16>,
    %16 = vector.extract_strided_slice %6 {offsets = [0, 1, 1, 0, 0], sizes = [1, 1, 8, 8, 4], strides = [1, 1, 1, 1, 1]} : vector<1x2x9x8x4xbf16> to vector<1x1x8x8x4xbf16>
    %17 = vector.shape_cast %16 : vector<1x1x8x8x4xbf16> to vector<1x8x8x4xbf16>
    %c0_15 = arith.constant 0 : index
    %c0_16 = arith.constant 0 : index
    %c0_17 = arith.constant 0 : index
    %c12 = arith.constant 12 : index
    %18 = vector.load %arg6[%c0_15, %c0_16, %c0_17, %c12] : memref<1x8x8x64xbf16, #tpu.memory_space<vmem>>, vector<1x8x8x4xbf16>
    tpu.vector_store %arg6[%c0_15, %c0_16, %c0_17, %c12], %17 {strides = array<i32>} : memref<1x8x8x64xbf16, #tpu.memory_space<vmem>>, vector<1x8x8x4xbf16>,
    %19 = vector.extract_strided_slice %5 {offsets = [0, 2, 0, 0, 0], sizes = [1, 2, 9, 8, 4], strides = [1, 1, 1, 1, 1]} : vector<1x4x9x9x4xbf16> to vector<1x2x9x8x4xbf16>
    %20 = vector.extract_strided_slice %19 {offsets = [0, 0, 0, 0, 0], sizes = [1, 1, 8, 8, 4], strides = [1, 1, 1, 1, 1]} : vector<1x2x9x8x4xbf16> to vector<1x1x8x8x4xbf16>
    %21 = vector.shape_cast %20 : vector<1x1x8x8x4xbf16> to vector<1x8x8x4xbf16>
    %c0_18 = arith.constant 0 : index
    %c0_19 = arith.constant 0 : index
    %c0_20 = arith.constant 0 : index
    %c16 = arith.constant 16 : index
    %22 = vector.load %arg6[%c0_18, %c0_19, %c0_20, %c16] : memref<1x8x8x64xbf16, #tpu.memory_space<vmem>>, vector<1x8x8x4xbf16>
    tpu.vector_store %arg6[%c0_18, %c0_19, %c0_20, %c16], %21 {strides = array<i32>} : memref<1x8x8x64xbf16, #tpu.memory_space<vmem>>, vector<1x8x8x4xbf16>,
    %23 = vector.extract_strided_slice %19 {offsets = [0, 1, 0, 0, 0], sizes = [1, 1, 8, 8, 4], strides = [1, 1, 1, 1, 1]} : vector<1x2x9x8x4xbf16> to vector<1x1x8x8x4xbf16>
    %24 = vector.shape_cast %23 : vector<1x1x8x8x4xbf16> to vector<1x8x8x4xbf16>
    %c0_21 = arith.constant 0 : index
    %c0_22 = arith.constant 0 : index
    %c0_23 = arith.constant 0 : index
    %c20 = arith.constant 20 : index
    %25 = vector.load %arg6[%c0_21, %c0_22, %c0_23, %c20] : memref<1x8x8x64xbf16, #tpu.memory_space<vmem>>, vector<1x8x8x4xbf16>
    tpu.vector_store %arg6[%c0_21, %c0_22, %c0_23, %c20], %24 {strides = array<i32>} : memref<1x8x8x64xbf16, #tpu.memory_space<vmem>>, vector<1x8x8x4xbf16>,
    %26 = vector.extract_strided_slice %19 {offsets = [0, 0, 1, 0, 0], sizes = [1, 1, 8, 8, 4], strides = [1, 1, 1, 1, 1]} : vector<1x2x9x8x4xbf16> to vector<1x1x8x8x4xbf16>
    %27 = vector.shape_cast %26 : vector<1x1x8x8x4xbf16> to vector<1x8x8x4xbf16>
    %c0_24 = arith.constant 0 : index
    %c0_25 = arith.constant 0 : index
    %c0_26 = arith.constant 0 : index
    %c24 = arith.constant 24 : index
    %28 = vector.load %arg6[%c0_24, %c0_25, %c0_26, %c24] : memref<1x8x8x64xbf16, #tpu.memory_space<vmem>>, vector<1x8x8x4xbf16>
    tpu.vector_store %arg6[%c0_24, %c0_25, %c0_26, %c24], %27 {strides = array<i32>} : memref<1x8x8x64xbf16, #tpu.memory_space<vmem>>, vector<1x8x8x4xbf16>,
    %29 = vector.extract_strided_slice %19 {offsets = [0, 1, 1, 0, 0], sizes = [1, 1, 8, 8, 4], strides = [1, 1, 1, 1, 1]} : vector<1x2x9x8x4xbf16> to vector<1x1x8x8x4xbf16>
    %30 = vector.shape_cast %29 : vector<1x1x8x8x4xbf16> to vector<1x8x8x4xbf16>
    %c0_27 = arith.constant 0 : index
    %c0_28 = arith.constant 0 : index
    %c0_29 = arith.constant 0 : index
    %c28 = arith.constant 28 : index
    %31 = vector.load %arg6[%c0_27, %c0_28, %c0_29, %c28] : memref<1x8x8x64xbf16, #tpu.memory_space<vmem>>, vector<1x8x8x4xbf16>
    tpu.vector_store %arg6[%c0_27, %c0_28, %c0_29, %c28], %30 {strides = array<i32>} : memref<1x8x8x64xbf16, #tpu.memory_space<vmem>>, vector<1x8x8x4xbf16>,
    %32 = vector.extract_strided_slice %5 {offsets = [0, 0, 0, 1, 0], sizes = [1, 2, 9, 8, 4], strides = [1, 1, 1, 1, 1]} : vector<1x4x9x9x4xbf16> to vector<1x2x9x8x4xbf16>
    %33 = vector.extract_strided_slice %32 {offsets = [0, 0, 0, 0, 0], sizes = [1, 1, 8, 8, 4], strides = [1, 1, 1, 1, 1]} : vector<1x2x9x8x4xbf16> to vector<1x1x8x8x4xbf16>
    %34 = vector.shape_cast %33 : vector<1x1x8x8x4xbf16> to vector<1x8x8x4xbf16>
    %c0_30 = arith.constant 0 : index
    %c0_31 = arith.constant 0 : index
    %c0_32 = arith.constant 0 : index
    %c32 = arith.constant 32 : index
    %35 = vector.load %arg6[%c0_30, %c0_31, %c0_32, %c32] : memref<1x8x8x64xbf16, #tpu.memory_space<vmem>>, vector<1x8x8x4xbf16>
    tpu.vector_store %arg6[%c0_30, %c0_31, %c0_32, %c32], %34 {strides = array<i32>} : memref<1x8x8x64xbf16, #tpu.memory_space<vmem>>, vector<1x8x8x4xbf16>,
    %36 = vector.extract_strided_slice %32 {offsets = [0, 1, 0, 0, 0], sizes = [1, 1, 8, 8, 4], strides = [1, 1, 1, 1, 1]} : vector<1x2x9x8x4xbf16> to vector<1x1x8x8x4xbf16>
    %37 = vector.shape_cast %36 : vector<1x1x8x8x4xbf16> to vector<1x8x8x4xbf16>
    %c0_33 = arith.constant 0 : index
    %c0_34 = arith.constant 0 : index
    %c0_35 = arith.constant 0 : index
    %c36 = arith.constant 36 : index
    %38 = vector.load %arg6[%c0_33, %c0_34, %c0_35, %c36] : memref<1x8x8x64xbf16, #tpu.memory_space<vmem>>, vector<1x8x8x4xbf16>
    tpu.vector_store %arg6[%c0_33, %c0_34, %c0_35, %c36], %37 {strides = array<i32>} : memref<1x8x8x64xbf16, #tpu.memory_space<vmem>>, vector<1x8x8x4xbf16>,
    %39 = vector.extract_strided_slice %32 {offsets = [0, 0, 1, 0, 0], sizes = [1, 1, 8, 8, 4], strides = [1, 1, 1, 1, 1]} : vector<1x2x9x8x4xbf16> to vector<1x1x8x8x4xbf16>
    %40 = vector.shape_cast %39 : vector<1x1x8x8x4xbf16> to vector<1x8x8x4xbf16>
    %c0_36 = arith.constant 0 : index
    %c0_37 = arith.constant 0 : index
    %c0_38 = arith.constant 0 : index
    %c40 = arith.constant 40 : index
    %41 = vector.load %arg6[%c0_36, %c0_37, %c0_38, %c40] : memref<1x8x8x64xbf16, #tpu.memory_space<vmem>>, vector<1x8x8x4xbf16>
    tpu.vector_store %arg6[%c0_36, %c0_37, %c0_38, %c40], %40 {strides = array<i32>} : memref<1x8x8x64xbf16, #tpu.memory_space<vmem>>, vector<1x8x8x4xbf16>,
    %42 = vector.extract_strided_slice %32 {offsets = [0, 1, 1, 0, 0], sizes = [1, 1, 8, 8, 4], strides = [1, 1, 1, 1, 1]} : vector<1x2x9x8x4xbf16> to vector<1x1x8x8x4xbf16>
    %43 = vector.shape_cast %42 : vector<1x1x8x8x4xbf16> to vector<1x8x8x4xbf16>
    %c0_39 = arith.constant 0 : index
    %c0_40 = arith.constant 0 : index
    %c0_41 = arith.constant 0 : index
    %c44 = arith.constant 44 : index
    %44 = vector.load %arg6[%c0_39, %c0_40, %c0_41, %c44] : memref<1x8x8x64xbf16, #tpu.memory_space<vmem>>, vector<1x8x8x4xbf16>
    tpu.vector_store %arg6[%c0_39, %c0_40, %c0_41, %c44], %43 {strides = array<i32>} : memref<1x8x8x64xbf16, #tpu.memory_space<vmem>>, vector<1x8x8x4xbf16>,
    %45 = vector.extract_strided_slice %5 {offsets = [0, 2, 0, 1, 0], sizes = [1, 2, 9, 8, 4], strides = [1, 1, 1, 1, 1]} : vector<1x4x9x9x4xbf16> to vector<1x2x9x8x4xbf16>
    %46 = vector.extract_strided_slice %45 {offsets = [0, 0, 0, 0, 0], sizes = [1, 1, 8, 8, 4], strides = [1, 1, 1, 1, 1]} : vector<1x2x9x8x4xbf16> to vector<1x1x8x8x4xbf16>
    %47 = vector.shape_cast %46 : vector<1x1x8x8x4xbf16> to vector<1x8x8x4xbf16>
    %c0_42 = arith.constant 0 : index
    %c0_43 = arith.constant 0 : index
    %c0_44 = arith.constant 0 : index
    %c48 = arith.constant 48 : index
    %48 = vector.load %arg6[%c0_42, %c0_43, %c0_44, %c48] : memref<1x8x8x64xbf16, #tpu.memory_space<vmem>>, vector<1x8x8x4xbf16>
    tpu.vector_store %arg6[%c0_42, %c0_43, %c0_44, %c48], %47 {strides = array<i32>} : memref<1x8x8x64xbf16, #tpu.memory_space<vmem>>, vector<1x8x8x4xbf16>,
    %49 = vector.extract_strided_slice %45 {offsets = [0, 1, 0, 0, 0], sizes = [1, 1, 8, 8, 4], strides = [1, 1, 1, 1, 1]} : vector<1x2x9x8x4xbf16> to vector<1x1x8x8x4xbf16>
    %50 = vector.shape_cast %49 : vector<1x1x8x8x4xbf16> to vector<1x8x8x4xbf16>
    %c0_45 = arith.constant 0 : index
    %c0_46 = arith.constant 0 : index
    %c0_47 = arith.constant 0 : index
    %c52 = arith.constant 52 : index
    %51 = vector.load %arg6[%c0_45, %c0_46, %c0_47, %c52] : memref<1x8x8x64xbf16, #tpu.memory_space<vmem>>, vector<1x8x8x4xbf16>
    tpu.vector_store %arg6[%c0_45, %c0_46, %c0_47, %c52], %50 {strides = array<i32>} : memref<1x8x8x64xbf16, #tpu.memory_space<vmem>>, vector<1x8x8x4xbf16>,
    %52 = vector.extract_strided_slice %45 {offsets = [0, 0, 1, 0, 0], sizes = [1, 1, 8, 8, 4], strides = [1, 1, 1, 1, 1]} : vector<1x2x9x8x4xbf16> to vector<1x1x8x8x4xbf16>
    %53 = vector.shape_cast %52 : vector<1x1x8x8x4xbf16> to vector<1x8x8x4xbf16>
    %c0_48 = arith.constant 0 : index
    %c0_49 = arith.constant 0 : index
    %c0_50 = arith.constant 0 : index
    %c56 = arith.constant 56 : index
    %54 = vector.load %arg6[%c0_48, %c0_49, %c0_50, %c56] : memref<1x8x8x64xbf16, #tpu.memory_space<vmem>>, vector<1x8x8x4xbf16>
    tpu.vector_store %arg6[%c0_48, %c0_49, %c0_50, %c56], %53 {strides = array<i32>} : memref<1x8x8x64xbf16, #tpu.memory_space<vmem>>, vector<1x8x8x4xbf16>,
    %55 = vector.extract_strided_slice %45 {offsets = [0, 1, 1, 0, 0], sizes = [1, 1, 8, 8, 4], strides = [1, 1, 1, 1, 1]} : vector<1x2x9x8x4xbf16> to vector<1x1x8x8x4xbf16>
    %56 = vector.shape_cast %55 : vector<1x1x8x8x4xbf16> to vector<1x8x8x4xbf16>
    %c0_51 = arith.constant 0 : index
    %c0_52 = arith.constant 0 : index
    %c0_53 = arith.constant 0 : index
    %c60 = arith.constant 60 : index
    %57 = vector.load %arg6[%c0_51, %c0_52, %c0_53, %c60] : memref<1x8x8x64xbf16, #tpu.memory_space<vmem>>, vector<1x8x8x4xbf16>
    tpu.vector_store %arg6[%c0_51, %c0_52, %c0_53, %c60], %56 {strides = array<i32>} : memref<1x8x8x64xbf16, #tpu.memory_space<vmem>>, vector<1x8x8x4xbf16>,
    %c0_54 = arith.constant 0 : index
    %c0_55 = arith.constant 0 : index
    %c0_56 = arith.constant 0 : index
    %c0_57 = arith.constant 0 : index
    %58 = vector.load %arg6[%c0_54, %c0_55, %c0_56, %c0_57] : memref<1x8x8x64xbf16, #tpu.memory_space<vmem>>, vector<1x8x8x64xbf16>
    %59 = vector.shape_cast %58 : vector<1x8x8x64xbf16> to vector<64x64xbf16>
    %c0_58 = arith.constant 0 : index
    %c0_59 = arith.constant 0 : index
    %60 = vector.load %arg2[%c0_58, %c0_59] : memref<64x16xbf16, #tpu.memory_space<vmem>>, vector<64x16xbf16>
    %cst_60 = arith.constant dense<0.000000e+00> : vector<64x16xf32>
    %61 = tpu.matmul %59, %60, %cst_60 {dimension_numbers = #tpu.dot_dimension_numbers<[1], [0], [0], [1], [0, 0, 1, 1], [], []>} : vector<64x64xbf16>, vector<64x16xbf16>, vector<64x16xf32> -> vector<64x16xf32>
    %62 = vector.shape_cast %61 : vector<64x16xf32> to vector<1x64x16xf32>
    %cst_61 = arith.constant dense<0.000000e+00> : vector<1xf32>
    %63 = vector.multi_reduction <add>, %62, %cst_61 [1, 2] : vector<1x64x16xf32> to vector<1xf32>
    %64 = vector.shape_cast %63 : vector<1xf32> to vector<1x1x1xf32>
    %65 = arith.mulf %62, %62 : vector<1x64x16xf32>
    %cst_62 = arith.constant dense<0.000000e+00> : vector<1xf32>
    %66 = vector.multi_reduction <add>, %65, %cst_62 [1, 2] : vector<1x64x16xf32> to vector<1xf32>
    %67 = vector.shape_cast %66 : vector<1xf32> to vector<1x1x1xf32>
    %cst_63 = arith.constant 9.765625E-4 : f32
    %68 = vector.broadcast %cst_63 : f32 to vector<1x1x1xf32>
    %69 = arith.mulf %64, %68 : vector<1x1x1xf32>
    %cst_64 = arith.constant 9.765625E-4 : f32
    %70 = vector.broadcast %cst_64 : f32 to vector<1x1x1xf32>
    %71 = arith.mulf %67, %70 : vector<1x1x1xf32>
    %72 = arith.mulf %69, %69 : vector<1x1x1xf32>
    %73 = arith.subf %71, %72 : vector<1x1x1xf32>
    %cst_65 = arith.constant 1.000000e-03 : f32
    %74 = vector.broadcast %cst_65 : f32 to vector<1x1x1xf32>
    %75 = arith.addf %73, %74 : vector<1x1x1xf32>
    %76 = math.rsqrt %75 : vector<1x1x1xf32>
    %c0_66 = arith.constant 0 : index
    %c0_67 = arith.constant 0 : index
    %77 = memref.load %arg3[%c0_66, %c0_67] : memref<1x1xf32, #tpu.memory_space<smem>>
    %78 = vector.broadcast %77 : f32 to vector<1x1x1xf32>
    %79 = arith.mulf %76, %78 : vector<1x1x1xf32>
    %c0_68 = arith.constant 0 : index
    %c0_69 = arith.constant 0 : index
    %80 = memref.load %arg4[%c0_68, %c0_69] : memref<1x1xf32, #tpu.memory_space<smem>>
    %81 = arith.mulf %69, %79 : vector<1x1x1xf32>
    %82 = vector.broadcast %80 : f32 to vector<1x1x1xf32>
    %83 = arith.subf %82, %81 : vector<1x1x1xf32>
    %84 = vector.broadcast %79 : vector<1x1x1xf32> to vector<1x64x16xf32>
    %85 = arith.mulf %62, %84 : vector<1x64x16xf32>
    %86 = vector.broadcast %83 : vector<1x1x1xf32> to vector<1x64x16xf32>
    %87 = arith.addf %85, %86 : vector<1x64x16xf32>
    %88 = vector.extract_strided_slice %87 {offsets = [0, 0, 0], sizes = [1, 8, 16], strides = [1, 1, 1]} : vector<1x64x16xf32> to vector<1x8x16xf32>
    %c0_70 = arith.constant 0 : index
    %c0_71 = arith.constant 0 : index
    %c0_72 = arith.constant 0 : index
    %89 = vector.load %arg5[%c0_70, %c0_71, %c0_72] : memref<1x8x128xf32, #tpu.memory_space<vmem>>, vector<1x8x16xf32>
    tpu.vector_store %arg5[%c0_70, %c0_71, %c0_72], %88 {strides = array<i32>} : memref<1x8x128xf32, #tpu.memory_space<vmem>>, vector<1x8x16xf32>,
    %90 = vector.extract_strided_slice %87 {offsets = [0, 8, 0], sizes = [1, 8, 16], strides = [1, 1, 1]} : vector<1x64x16xf32> to vector<1x8x16xf32>
    %c0_73 = arith.constant 0 : index
    %c0_74 = arith.constant 0 : index
    %c16_75 = arith.constant 16 : index
    %91 = vector.load %arg5[%c0_73, %c0_74, %c16_75] : memref<1x8x128xf32, #tpu.memory_space<vmem>>, vector<1x8x16xf32>
    tpu.vector_store %arg5[%c0_73, %c0_74, %c16_75], %90 {strides = array<i32>} : memref<1x8x128xf32, #tpu.memory_space<vmem>>, vector<1x8x16xf32>,
    %92 = vector.extract_strided_slice %87 {offsets = [0, 16, 0], sizes = [1, 8, 16], strides = [1, 1, 1]} : vector<1x64x16xf32> to vector<1x8x16xf32>
    %c0_76 = arith.constant 0 : index
    %c0_77 = arith.constant 0 : index
    %c32_78 = arith.constant 32 : index
    %93 = vector.load %arg5[%c0_76, %c0_77, %c32_78] : memref<1x8x128xf32, #tpu.memory_space<vmem>>, vector<1x8x16xf32>
    tpu.vector_store %arg5[%c0_76, %c0_77, %c32_78], %92 {strides = array<i32>} : memref<1x8x128xf32, #tpu.memory_space<vmem>>, vector<1x8x16xf32>,
    %94 = vector.extract_strided_slice %87 {offsets = [0, 24, 0], sizes = [1, 8, 16], strides = [1, 1, 1]} : vector<1x64x16xf32> to vector<1x8x16xf32>
    %c0_79 = arith.constant 0 : index
    %c0_80 = arith.constant 0 : index
    %c48_81 = arith.constant 48 : index
    %95 = vector.load %arg5[%c0_79, %c0_80, %c48_81] : memref<1x8x128xf32, #tpu.memory_space<vmem>>, vector<1x8x16xf32>
    tpu.vector_store %arg5[%c0_79, %c0_80, %c48_81], %94 {strides = array<i32>} : memref<1x8x128xf32, #tpu.memory_space<vmem>>, vector<1x8x16xf32>,
    %96 = vector.extract_strided_slice %87 {offsets = [0, 32, 0], sizes = [1, 8, 16], strides = [1, 1, 1]} : vector<1x64x16xf32> to vector<1x8x16xf32>
    %c0_82 = arith.constant 0 : index
    %c0_83 = arith.constant 0 : index
    %c64 = arith.constant 64 : index
    %97 = vector.load %arg5[%c0_82, %c0_83, %c64] : memref<1x8x128xf32, #tpu.memory_space<vmem>>, vector<1x8x16xf32>
    tpu.vector_store %arg5[%c0_82, %c0_83, %c64], %96 {strides = array<i32>} : memref<1x8x128xf32, #tpu.memory_space<vmem>>, vector<1x8x16xf32>,
    %98 = vector.extract_strided_slice %87 {offsets = [0, 40, 0], sizes = [1, 8, 16], strides = [1, 1, 1]} : vector<1x64x16xf32> to vector<1x8x16xf32>
    %c0_84 = arith.constant 0 : index
    %c0_85 = arith.constant 0 : index
    %c80 = arith.constant 80 : index
    %99 = vector.load %arg5[%c0_84, %c0_85, %c80] : memref<1x8x128xf32, #tpu.memory_space<vmem>>, vector<1x8x16xf32>
    tpu.vector_store %arg5[%c0_84, %c0_85, %c80], %98 {strides = array<i32>} : memref<1x8x128xf32, #tpu.memory_space<vmem>>, vector<1x8x16xf32>,
    %100 = vector.extract_strided_slice %87 {offsets = [0, 48, 0], sizes = [1, 8, 16], strides = [1, 1, 1]} : vector<1x64x16xf32> to vector<1x8x16xf32>
    %c0_86 = arith.constant 0 : index
    %c0_87 = arith.constant 0 : index
    %c96 = arith.constant 96 : index
    %101 = vector.load %arg5[%c0_86, %c0_87, %c96] : memref<1x8x128xf32, #tpu.memory_space<vmem>>, vector<1x8x16xf32>
    tpu.vector_store %arg5[%c0_86, %c0_87, %c96], %100 {strides = array<i32>} : memref<1x8x128xf32, #tpu.memory_space<vmem>>, vector<1x8x16xf32>,
    %102 = vector.extract_strided_slice %87 {offsets = [0, 56, 0], sizes = [1, 8, 16], strides = [1, 1, 1]} : vector<1x64x16xf32> to vector<1x8x16xf32>
    %c0_88 = arith.constant 0 : index
    %c0_89 = arith.constant 0 : index
    %c112 = arith.constant 112 : index
    %103 = vector.load %arg5[%c0_88, %c0_89, %c112] : memref<1x8x128xf32, #tpu.memory_space<vmem>>, vector<1x8x16xf32>
    tpu.vector_store %arg5[%c0_88, %c0_89, %c112], %102 {strides = array<i32>} : memref<1x8x128xf32, #tpu.memory_space<vmem>>, vector<1x8x16xf32>,
    return
  }
  func.func @transform_0(%arg0: i32) -> (i32, i32, i32, i32, i32) {
    %c0_i32 = arith.constant 0 : i32
    %c0_i32_0 = arith.constant 0 : i32
    %c0_i32_1 = arith.constant 0 : i32
    %c0_i32_2 = arith.constant 0 : i32
    %c0_i32_3 = arith.constant 0 : i32
    return %arg0, %c0_i32, %c0_i32_0, %c0_i32_1, %c0_i32_2 : i32, i32, i32, i32, i32
  }
  func.func @transform_1(%arg0: i32) -> (i32, i32) {
    %c0_i32 = arith.constant 0 : i32
    %c0_i32_0 = arith.constant 0 : i32
    %c0_i32_1 = arith.constant 0 : i32
    return %c0_i32, %c0_i32_0 : i32, i32
  }
  func.func @transform_2(%arg0: i32) -> (i32, i32) {
    %c0_i32 = arith.constant 0 : i32
    %c0_i32_0 = arith.constant 0 : i32
    %c0_i32_1 = arith.constant 0 : i32
    return %c0_i32, %c0_i32_0 : i32, i32
  }
  func.func @transform_3(%arg0: i32) -> (i32, i32) {
    %c0_i32 = arith.constant 0 : i32
    %c0_i32_0 = arith.constant 0 : i32
    %c0_i32_1 = arith.constant 0 : i32
    return %c0_i32, %c0_i32_0 : i32, i32
  }
  func.func @transform_4(%arg0: i32) -> (i32, i32, i32) {
    %c0_i32 = arith.constant 0 : i32
    %c0_i32_0 = arith.constant 0 : i32
    %c0_i32_1 = arith.constant 0 : i32
    return %arg0, %c0_i32, %c0_i32_0 : i32, i32, i32
  }
}

</mosaic_0001>

<bundles_post_ra>
// kernel: block_forward.1
= control target key start
LH: loop header
LB: loop body
LE: loop exit
PB: predicated region body
PF: predicated region fallthrough
CT: control target
= control target key end

     0   :  { %s2001_s19 = smov 0   ;;  %s2874_s0 = inlined_call_operand.vmem [shape: bf16[2,4,9,9,4], index: 0, kind: input, shape index: {}]   ;;  %s2875_s1 = inlined_call_operand.vmem [shape: bf16[64,16], index: 1, kind: input, shape index: {}]   ;;  %s2876_s2 = inlined_call_operand.<no memory space> [shape: f32[1,1], index: 2, kind: input, shape index: {}]   ;;  %s2877_s3 = inlined_call_operand.<no memory space> [shape: f32[1,1], index: 3, kind: input, shape index: {}]   ;;  %s2878_s4 = inlined_call_operand.vmem [shape: f32[2,8,128], index: 4, kind: output, shape index: {}]  }
   0x1   :  { %9 = sst [smem:[#allocation3]] %s2876_s2 }
   0x2   :  { %10 = sst [smem:[#allocation4]] %s2877_s3 }
   0x3 LB: > { %s1852_s20 = sadd.s32 4294967295, %s1949_s19   ;;  %p1856_p0 = scmp.ge.s32.totalorder %s1949_s19, 1  ;;  %s1949_s19 = sphi %s2001_s19, %s16_s19  }
   0x4   : > { %p164_p1 = scmp.lt.s32.totalorder %s1949_s19, 3 }
   0x6   : > { %p165_p2 = pnand %p1856_p0, %p164_p1 }
   0x7   : > { %p189_p3 = scmp.lt.s32.totalorder (!%p165_p2), %s1852_s20, 1  ;;  %s1951_s23 = smov (!%p165_p2), 4   ;;  %vm488_vm5 = vcmask (!%p165_p2), 27648  }
   0x8   : > { %168 = sbr.rel (%p165_p2) target bundleno = 913 (0x391), region = 36  ;;  %s1952_s24 = smov (!%p165_p2), 8  }
   0x9   : > { %s1953_s25 = smov (!%p165_p2), 12   ;;  %s1954_s26 = smov (!%p165_p2), 16  }
   0xa   : > { %s1955_s27 = smov (!%p165_p2), 20   ;;  %s1956_s28 = smov (!%p165_p2), 24  }
   0xb   : > { %s1957_s29 = smov (!%p165_p2), 28   ;;  %s1958_s30 = smov (!%p165_p2), 32  }
   0xc   : > { %s1959_s5 = smov (!%p165_p2), 36   ;;  %s1960_s6 = smov (!%p165_p2), 40  }
   0xd   : > { %s1961_s7 = smov (!%p165_p2), 44   ;;  %s1962_s8 = smov (!%p165_p2), 48  }
   0xe   : > { %s1963_s9 = smov (!%p165_p2), 52   ;;  %s1964_s10 = smov (!%p165_p2), 56  }
   0xf   : > { %s2882_s20 = smov (!%p189_p3, %s1852_s20), 1  ;;  %s1965_s17 = smov 60  }
  0x10   : > { %s1905_s2 = smul.u32 288, %s2882_s20  ;;  %s1733_s3 = sld [smem:[#allocation3]] }
  0x11   : > { %s1736_s21 = sld [smem:[#allocation4]] }
  0x12   : > { %s2015_s22 = scalar_lea.vmem %s2874_s0, %s1905_s2 }
  0x13   : > { %v222_v0 = vld [vmem:[%s2015_s22 + $0x58] sm:$0xf]  ;;  %v218_v1 = vld [vmem:[%s2015_s22 + $0x48] sm:$0xf]  ;;  %v224_v2 = vld [vmem:[%s2015_s22 + $0x60] sm:$0xf] }
  0x14   : > { %vm294_vm0 = vcmp.gt.bf16.partialorder %v222_v0, 0  ;;  %v366_v3 = vmul.bf16 1045249613, %v222_v0  ;;  %vm290_vm1 = vcmp.gt.bf16.partialorder %v218_v1, 0  ;;  %v362_v4 = vmul.bf16 1045249613, %v218_v1 }
  0x15   : > { %vm296_vm2 = vcmp.gt.bf16.partialorder %v224_v2, 0  ;;  %v368_v5 = vmul.bf16 1045249613, %v224_v2  ;;  %v220_v6 = vld [vmem:[%s2015_s22 + $0x50] sm:$0xf] }
  0x16   : > { %v2021_v7 = vsel %vm294_vm0, %v222_v0, %v366_v3  ;;  %v2023_v8 = vsel %vm290_vm1, %v218_v1, %v362_v4  ;;  %vm292_vm3 = vcmp.gt.bf16.partialorder %v220_v6, 0  ;;  %v364_v9 = vmul.bf16 1045249613, %v220_v6  ;;  %v204_v10 = vld [vmem:[%s2015_s22 + $0x10] sm:$0xf] }
  0x17   : > { %509 = vrot.lane.b32.xlu1 %v2021_v7, %s1951_s23  ;;  %505 = vrot.lane.b32.xlu0 %v2023_v8, %s1951_s23  ;;  %v2030_v11 = vsel %vm296_vm2, %v224_v2, %v368_v5  ;;  %vm276_vm4 = vcmp.gt.bf16.partialorder %v204_v10, 0  ;;  %v348_v13 = vmul.bf16 1045249613, %v204_v10  ;;  %v202_v14 = vld [vmem:[%s2015_s22 + $0x8] sm:$0xf]  ;;  %v912_v57 = vshrl.u32 %v2023_v8, 16 }
  0x18   : > { %v2032_v12 = vsel %vm292_vm3, %v220_v6, %v364_v9  ;;  %v208_v15 = vld [vmem:[%s2015_s22 + $0x20] sm:$0xf]  ;;  %vm274_vm6 = vcmp.gt.bf16.partialorder %v202_v14, 0  ;;  %v346_v17 = vmul.bf16 1045249613, %v202_v14  ;;  %v915_v58 = vshll.u32 %v2023_v8, 16 }
  0x19   : > { %v2040_v16 = vsel %vm276_vm4, %v204_v10, %v348_v13  ;;  %v206_v18 = vld [vmem:[%s2015_s22 + $0x18] sm:$0xf]  ;;  %vm280_vm7 = vcmp.gt.bf16.partialorder %v208_v15, 0  ;;  %v352_v20 = vmul.bf16 1045249613, %v208_v15  ;;  %v926_v59 = vshrl.u32 %v2032_v12, 16 }
  0x1a   : > { %491 = vst.msk [vmem:[#allocation2 + $0x8] sm:$0xf] %vm488_vm5, %v2040_v16  ;;  %v2045_v19 = vsel %vm274_vm6, %v202_v14, %v346_v17  ;;  %vm278_vm8 = vcmp.gt.bf16.partialorder %v206_v18, 0  ;;  %v350_v21 = vmul.bf16 1045249613, %v206_v18  ;;  %v929_v3 = vshll.u32 %v2032_v12, 16 }
  0x1b   : > { %511 = vrot.lane.b32.xlu1 %v2030_v11, %s1951_s23  ;;  %507 = vrot.lane.b32.xlu0 %v2032_v12, %s1951_s23  ;;  %490 = vst.msk [vmem:[#allocation2 + $0x4] sm:$0xf] %vm488_vm5, %v2045_v19  ;;  %v2053_v22 = vsel %vm280_vm7, %v208_v15, %v352_v20  ;;  %v226_v24 = vld [vmem:[%s2015_s22 + $0x68] sm:$0xf]  ;;  %v238_v26 = vld [vmem:[%s2015_s22 + $0x98] sm:$0xf] }
  0x1c   : > { %v2055_v23 = vsel %vm278_vm8, %v206_v18, %v350_v21  ;;  %493 = vst.msk [vmem:[#allocation2 + $0x10] sm:$0xf] %vm488_vm5, %v2053_v22  ;;  %v370_v25 = vmul.bf16 1045249613, %v226_v24  ;;  %vm298_vm9 = vcmp.gt.bf16.partialorder %v226_v24, 0  ;;  %vm310_vm10 = vcmp.gt.bf16.partialorder %v238_v26, 0 }
  0x1d   : > { %492 = vst.msk [vmem:[#allocation2 + $0xc] sm:$0xf] %vm488_vm5, %v2055_v23  ;;  %v236_v27 = vld [vmem:[%s2015_s22 + $0x90] sm:$0xf]  ;;  %v382_v29 = vmul.bf16 1045249613, %v238_v26 }
  0x1e   : > { %v2072_v28 = vsel %vm298_vm9, %v226_v24, %v370_v25  ;;  %v380_v30 = vmul.bf16 1045249613, %v236_v27  ;;  %vm308_vm11 = vcmp.gt.bf16.partialorder %v236_v27, 0  ;;  %v242_v31 = vld [vmem:[%s2015_s22 + $0xa8] sm:$0xf]  ;;  %v781_v60 = vshrl.u32 %v2045_v19, 16 }
  0x1f   : > { %548 = vrot.lane.b32.xlu1 %v2040_v16, %s1952_s24  ;;  %546 = vrot.lane.b32.xlu0 %v2045_v19, %s1952_s24  ;;  %v240_v32 = vld [vmem:[%s2015_s22 + $0xa0] sm:$0xf]  ;;  %v2080_v33 = vsel %vm310_vm10, %v238_v26, %v382_v29  ;;  %v386_v35 = vmul.bf16 1045249613, %v242_v31  ;;  %vm314_vm12 = vcmp.gt.bf16.partialorder %v242_v31, 0  ;;  %v784_v61 = vshll.u32 %v2045_v19, 16 }
  0x20   : > { %v2082_v34 = vsel %vm308_vm11, %v236_v27, %v380_v30  ;;  %v384_v36 = vmul.bf16 1045249613, %v240_v32  ;;  %vm312_vm13 = vcmp.gt.bf16.partialorder %v240_v32, 0  ;;  %v256_v37 = vld [vmem:[%s2015_s22 + $0xe0] sm:$0xf]  ;;  %v795_v4 = vshrl.u32 %v2040_v16, 16 }
  0x21   : > { %v254_v38 = vld [vmem:[%s2015_s22 + $0xd8] sm:$0xf]  ;;  %v2090_v39 = vsel %vm314_vm12, %v242_v31, %v386_v35  ;;  %v400_v41 = vmul.bf16 1045249613, %v256_v37  ;;  %vm328_vm14 = vcmp.gt.bf16.partialorder %v256_v37, 0  ;;  %v2128_v5 = vrot.slane %v912_v57, 4 }
  0x22   : > { %v2092_v40 = vsel %vm312_vm13, %v240_v32, %v384_v36  ;;  %v398_v42 = vmul.bf16 1045249613, %v254_v38  ;;  %vm326_vm15 = vcmp.gt.bf16.partialorder %v254_v38, 0  ;;  %v260_v43 = vld [vmem:[%s2015_s22 + $0xf0] sm:$0xf]  ;;  %v798_v6 = vshll.u32 %v2040_v16, 16 }
  0x23   : > { %552 = vrot.lane.b32.xlu1 %v2053_v22, %s1952_s24  ;;  %550 = vrot.lane.b32.xlu0 %v2055_v23, %s1952_s24  ;;  %v258_v44 = vld [vmem:[%s2015_s22 + $0xe8] sm:$0xf]  ;;  %v200_v45 = vld [vmem:[%s2015_s22] sm:$0xf]  ;;  %v2101_v46 = vsel %vm328_vm14, %v256_v37, %v400_v41  ;;  %v404_v48 = vmul.bf16 1045249613, %v260_v43 }
  0x24   : > { %v2103_v47 = vsel %vm326_vm15, %v254_v38, %v398_v42  ;;  %v402_v49 = vmul.bf16 1045249613, %v258_v44  ;;  %vm332_vm0 = vcmp.gt.bf16.partialorder %v260_v43, 0  ;;  %vm330_vm1 = vcmp.gt.bf16.partialorder %v258_v44, 0  ;;  %v244_v53 = vld [vmem:[%s2015_s22 + $0xb0] sm:$0xf] }
  0x25   : > { %vm272_vm2 = vcmp.gt.bf16.partialorder %v200_v45, 0  ;;  %v344_v50 = vmul.bf16 1045249613, %v200_v45  ;;  %v2109_v51 = vsel %vm332_vm0, %v260_v43, %v404_v48  ;;  %v203_v54 = vld [vmem:[%s2015_s22 + $0xc] sm:$0x1]  ;;  %vm316_vm3 = vcmp.gt.bf16.partialorder %v244_v53, 0 }
  0x26   : > { %v2111_v52 = vsel %vm330_vm1, %v258_v44, %v402_v49  ;;  %v201_v55 = vld [vmem:[%s2015_s22 + $0x4] sm:$0x1]  ;;  %v388_v62 = vmul.bf16 1045249613, %v244_v53  ;;  %v347_v63 = vmul.bf16 1045249613, %v203_v54 }
  0x27   : > { %582 = vrot.lane.b32.xlu1 %v2021_v7, %s1953_s25  ;;  %580 = vrot.lane.b32.xlu0 %v2032_v12, %s1953_s25  ;;  %v416_v56 = vsel %vm272_vm2, %v200_v45, %v344_v50  ;;  %v345_v0 = vmul.bf16 1045249613, %v201_v55  ;;  %vm275_vm4 = vcmp.gt.bf16.partialorder %v203_v54, 0  ;;  %vm273_vm6 = vcmp.gt.bf16.partialorder %v201_v55, 0  ;;  %v262_v13 = vld [vmem:[%s2015_s22 + $0xf8] sm:$0xf] }
  0x28   : > { %489 = vst.msk [vmem:[#allocation2] sm:$0xf] %vm488_vm5, %v416_v56  ;;  %v767_v1 = vshrl.u32 %v416_v56, 16  ;;  %v770_v2 = vshll.u32 %v416_v56, 16  ;;  %vm763_vm7 = vsmask.f32 3328  ;;  %v2137_v12 = vsel %vm316_vm3, %v244_v53, %v388_v62 }
  0x29   : > { %vm764_vm8 = vsmask.f32 7440  ;;  %v783_v8 = vrot.slane %v781_v60, 4  ;;  %v786_v9 = vrot.slane %v784_v61, 5  ;;  %v809_v10 = vshrl.u32 %v2055_v23, 16 }
  0x2a   : > { %v419_v14 = vsel %vm275_vm4, %v203_v54, %v347_v63  ;;  %v417_v15 = vsel %vm273_vm6, %v201_v55, %v345_v0  ;;  %v769_v16 = vrot.slane %v767_v1, 4  ;;  %v772_v17 = vrot.slane %v770_v2, 5  ;;  %v207_v24 = vld [vmem:[%s2015_s22 + $0x1c] sm:$0x1]  ;;  %v205_v27 = vld [vmem:[%s2015_s22 + $0x14] sm:$0x1]  ;;  %vm2170_vm13 = vmor %vm763_vm7, %vm764_vm8 }
  0x2b   : > { %586 = vrot.lane.b32.xlu1 %v2072_v28, %s1953_s25  ;;  %584 = vrot.lane.b32.xlu0 %v2030_v11, %s1953_s25  ;;  %v2140_v18 = vrot.slane %v915_v58, 5  ;;  %v2142_v19 = vrot.slane %v926_v59, 4  ;;  %v2144_v20 = vrot.slane %v929_v3, 5  ;;  %v2146_v21 = vrot.slane %v795_v4, 4  ;;  %v212_v29 = vld [vmem:[%s2015_s22 + $0x30] sm:$0xf] }
  0x2c   : > { %v2149_v25 = vrot.slane %v798_v6, 5  ;;  %v812_v26 = vshll.u32 %v2055_v23, 16  ;;  %v406_v30 = vmul.bf16 1045249613, %v262_v13  ;;  %v787_v31 = vor.u32 %v786_v9, %v783_v8  ;;  %v228_v38 = vld [vmem:[%s2015_s22 + $0x70] sm:$0xf] }
  0x2d   : > { %v790_v32 = vshll.u32 %v419_v14, 16  ;;  %v776_v35 = vshll.u32 %v417_v15, 16  ;;  %v811_v36 = vrot.slane %v809_v10, 4  ;;  %vm334_vm9 = vcmp.gt.bf16.partialorder %v262_v13, 0  ;;  %v221_v42 = vld [vmem:[%s2015_s22 + $0x54] sm:$0x1] }
  0x2e   : > { %v773_v37 = vor.u32 %v772_v17, %v769_v16  ;;  %v351_v41 = vmul.bf16 1045249613, %v207_v24  ;;  %vm279_vm10 = vcmp.gt.bf16.partialorder %v207_v24, 0  ;;  %v349_v23 = vmul.bf16 1045249613, %v205_v27 }
  0x2f   : > { %623 = vrot.lane.b32.xlu1 %v2080_v33, %s1954_s26  ;;  %621 = vrot.lane.b32.xlu0 %v2082_v34, %s1954_s26  ;;  %vm284_vm11 = vcmp.gt.bf16.partialorder %v212_v29, 0  ;;  %v814_v43 = vrot.slane %v812_v26, 5  ;;  %vm277_vm12 = vcmp.gt.bf16.partialorder %v205_v27, 0  ;;  %v219_v44 = vld [vmem:[%s2015_s22 + $0x4c] sm:$0x1]  ;;  %v2165_v48 = vsel %vm334_vm9, %v262_v13, %v406_v30 }
  0x30   : > { %v356_v45 = vmul.bf16 1045249613, %v212_v29  ;;  %v788_v49 = vrot.slane %v787_v31, 4  ;;  %v792_v50 = vrot.slane %v790_v32, 5  ;;  %v778_v53 = vrot.slane %v776_v35, 5 }
  0x31   : > { %v210_v54 = vld [vmem:[%s2015_s22 + $0x28] sm:$0xf]  ;;  %v774_v56 = vrot.slane %v773_v37, 4  ;;  %v423_v57 = vsel %vm279_vm10, %v207_v24, %v351_v41  ;;  %v365_v58 = vmul.bf16 1045249613, %v221_v42  ;;  %v421_v61 = vsel %vm277_vm12, %v205_v27, %v349_v23 }
  0x32   : > { %v2176_v59 = vsel %vm284_vm11, %v212_v29, %v356_v45  ;;  %v372_v60 = vmul.bf16 1045249613, %v228_v38  ;;  %vm293_vm14 = vcmp.gt.bf16.partialorder %v221_v42, 0  ;;  %v363_v62 = vmul.bf16 1045249613, %v219_v44 }
  0x33   : > { %627 = vrot.lane.b32.xlu1 %v2090_v39, %s1954_s26  ;;  %625 = vrot.lane.b32.xlu0 %v2092_v40, %s1954_s26  ;;  %495 = vst.msk [vmem:[#allocation2 + $0x18] sm:$0xf] %vm488_vm5, %v2176_v59  ;;  %v815_v63 = vor.u32 %v814_v43, %v811_v36  ;;  %vm291_vm15 = vcmp.gt.bf16.partialorder %v219_v44, 0  ;;  %vm282_vm0 = vcmp.gt.bf16.partialorder %v210_v54, 0  ;;  %v354_v0 = vmul.bf16 1045249613, %v210_v54 }
  0x34   : > { %v2187_v1 = vsel %vm2170_vm13, %v788_v49, %v792_v50  ;;  %vm300_vm1 = vcmp.gt.bf16.partialorder %v228_v38, 0  ;;  %v818_v2 = vshll.u32 %v423_v57, 16  ;;  %v801_v3 = vor.u32 %v2149_v25, %v2146_v21  ;;  %v214_v13 = vld [vmem:[%s2015_s22 + $0x38] sm:$0xf]  ;;  %v225_v30 = vld [vmem:[%s2015_s22 + $0x64] sm:$0x1] }
  0x35   : > { %v779_v4 = vsel %vm2170_vm13, %v774_v56, %v778_v53  ;;  %v804_v6 = vshll.u32 %v421_v61, 16  ;;  %v437_v8 = vsel %vm293_vm14, %v221_v42, %v365_v58  ;;  %v2193_v9 = vsel %vm282_vm0, %v210_v54, %v354_v0  ;;  %v223_v31 = vld [vmem:[%s2015_s22 + $0x5c] sm:$0x1]  ;;  %v230_v23 = vld [vmem:[%s2015_s22 + $0x78] sm:$0xf] }
  0x36   : > { %v435_v10 = vsel %vm291_vm15, %v219_v44, %v363_v62  ;;  %494 = vst.msk [vmem:[#allocation2 + $0x14] sm:$0xf] %vm488_vm5, %v2193_v9  ;;  %v918_v14 = vor.u32 %v2140_v18, %v2128_v5  ;;  %v2200_v15 = vsel %vm300_vm1, %v228_v38, %v372_v60  ;;  %v816_v16 = vrot.slane %v815_v63, 4 }
  0x37   : > { %664 = vrot.lane.b32.xlu1 %v2101_v46, %s1955_s27  ;;  %662 = vrot.lane.b32.xlu0 %v2103_v47, %s1955_s27  ;;  %v820_v17 = vrot.slane %v818_v2, 5  ;;  %v802_v21 = vrot.slane %v801_v3, 4  ;;  %v932_v24 = vor.u32 %v2144_v20, %v2142_v19  ;;  %v935_v25 = vshll.u32 %v437_v8, 16  ;;  %v232_v20 = vld [vmem:[%s2015_s22 + $0x80] sm:$0xf] }
  0x38   : > { %v806_v26 = vrot.slane %v804_v6, 5  ;;  %v921_v5 = vshll.u32 %v435_v10, 16  ;;  %vm286_vm2 = vcmp.gt.bf16.partialorder %v214_v13, 0  ;;  %v358_v18 = vmul.bf16 1045249613, %v214_v13 }
  0x39   : > { %v940_v27 = vshrl.u32 %v2021_v7, 16  ;;  %v943_v29 = vshll.u32 %v2021_v7, 16  ;;  %v954_v35 = vshrl.u32 %v2030_v11, 16  ;;  %v957_v36 = vshll.u32 %v2030_v11, 16 }
  0x3a   : > { %v2211_v32 = vsel %vm286_vm2, %v214_v13, %v358_v18  ;;  %v2221_v19 = vsel %vm2170_vm13, %v816_v16, %v820_v17  ;;  %v933_v7 = vrot.slane %v932_v24, 4  ;;  %v807_v37 = vsel %vm2170_vm13, %v802_v21, %v806_v26  ;;  %v209_v13 = vld [vmem:[%s2015_s22 + $0x24] sm:$0x1]  ;;  %v216_v24 = vld [vmem:[%s2015_s22 + $0x40] sm:$0xf] }
  0x3b   : > { %668 = vrot.lane.b32.xlu1 %v2109_v51, %s1955_s27  ;;  %666 = vrot.lane.b32.xlu0 %v2111_v52, %s1955_s27  ;;  %496 = vst.msk [vmem:[#allocation2 + $0x1c] sm:$0xf] %vm488_vm5, %v2211_v32  ;;  %v937_v38 = vrot.slane %v935_v25, 5  ;;  %v919_v11 = vrot.slane %v918_v14, 4  ;;  %v923_v41 = vrot.slane %v921_v5, 5  ;;  %v942_v44 = vrot.slane %v940_v27, 4 }
  0x3c   : > { %v369_v42 = vmul.bf16 1045249613, %v225_v30  ;;  %v367_v43 = vmul.bf16 1045249613, %v223_v31  ;;  %v945_v45 = vrot.slane %v943_v29, 5  ;;  %vm297_vm3 = vcmp.gt.bf16.partialorder %v225_v30, 0 }
  0x3d   : > { %vm295_vm4 = vcmp.gt.bf16.partialorder %v223_v31, 0  ;;  %v956_v49 = vrot.slane %v954_v35, 4  ;;  %v959_v50 = vrot.slane %v957_v36, 5  ;;  %v376_v53 = vmul.bf16 1045249613, %v232_v20 }
  0x3e   : > { %v374_v54 = vmul.bf16 1045249613, %v230_v23  ;;  %v2234_v56 = vsel %vm2170_vm13, %v933_v7, %v937_v38  ;;  %v924_v57 = vsel %vm2170_vm13, %v919_v11, %v923_v41  ;;  %vm304_vm5 = vcmp.gt.bf16.partialorder %v232_v20, 0  ;;  %v227_v36 = vld [vmem:[%s2015_s22 + $0x6c] sm:$0x1] }
  0x3f   : > { %698 = vrot.lane.b32.xlu1 %v2092_v40, %s1956_s28  ;;  %696 = vrot.lane.b32.xlu0 %v2080_v33, %s1956_s28  ;;  %vm302_vm6 = vcmp.gt.bf16.partialorder %v230_v23, 0  ;;  %v441_v58 = vsel %vm297_vm3, %v225_v30, %v369_v42  ;;  %v439_v60 = vsel %vm295_vm4, %v223_v31, %v367_v43  ;;  %v2241_v61 = vsel %vm304_vm5, %v232_v20, %v376_v53  ;;  %v239_v41 = vld [vmem:[%s2015_s22 + $0x9c] sm:$0x1] }
  0x40   : > { %v2243_v62 = vsel %vm302_vm6, %v230_v23, %v374_v54  ;;  %v960_v63 = vor.u32 %v959_v50, %v956_v49  ;;  %v963_v0 = vshll.u32 %v441_v58, 16  ;;  %v946_v2 = vor.u32 %v945_v45, %v942_v44  ;;  %v237_v23 = vld [vmem:[%s2015_s22 + $0x94] sm:$0x1]  ;;  %v246_v50 = vld [vmem:[%s2015_s22 + $0xb8] sm:$0xf] }
  0x41   : > { %v949_v3 = vshll.u32 %v439_v60, 16  ;;  %v823_v14 = vshrl.u32 %v2053_v22, 16  ;;  %v826_v16 = vshll.u32 %v2053_v22, 16  ;;  %v353_v25 = vmul.bf16 1045249613, %v209_v13 }
  0x42   : > { %v965_v6 = vrot.slane %v963_v0, 5  ;;  %v947_v8 = vrot.slane %v946_v2, 4  ;;  %vm281_vm7 = vcmp.gt.bf16.partialorder %v209_v13, 0  ;;  %v360_v18 = vmul.bf16 1045249613, %v216_v24 }
  0x43   : > { %702 = vrot.lane.b32.xlu1 %v2137_v12, %s1956_s28  ;;  %700 = vrot.lane.b32.xlu0 %v2090_v39, %s1956_s28  ;;  %v951_v10 = vrot.slane %v949_v3, 5  ;;  %v825_v26 = vrot.slane %v823_v14, 4  ;;  %v828_v5 = vrot.slane %v826_v16, 5  ;;  %vm288_vm8 = vcmp.gt.bf16.partialorder %v216_v24, 0 }
  0x44   : > { %v425_v22 = vsel %vm281_vm7, %v209_v13, %v353_v25  ;;  %v2269_v27 = vsel %vm288_vm8, %v216_v24, %v360_v18  ;;  %v971_v7 = vshll.u32 %v2072_v28, 16  ;;  %v371_v38 = vmul.bf16 1045249613, %v227_v36 }
  0x45   : > { %v952_v21 = vsel %vm2170_vm13, %v947_v8, %v951_v10  ;;  %v829_v29 = vor.u32 %v828_v5, %v825_v26  ;;  %v832_v30 = vshll.u32 %v425_v22, 16  ;;  %v1165_v11 = vshrl.u32 %v2080_v33, 16 }
  0x46   : > { %vm299_vm9 = vcmp.gt.bf16.partialorder %v227_v36, 0  ;;  %v1168_v42 = vshll.u32 %v2080_v33, 16  ;;  %v1151_v43 = vshrl.u32 %v2082_v34, 16  ;;  %v1154_v44 = vshll.u32 %v2082_v34, 16 }
  0x47   : > { %732 = vrot.lane.b32.xlu1 %v2111_v52, %s1957_s29  ;;  %730 = vrot.lane.b32.xlu0 %v2101_v46, %s1957_s29  ;;  %v830_v31 = vrot.slane %v829_v29, 4  ;;  %v834_v35 = vrot.slane %v832_v30, 5  ;;  %v973_v45 = vrot.slane %v971_v7, 5  ;;  %v443_v53 = vsel %vm299_vm9, %v227_v36, %v371_v38  ;;  %v241_v29 = vld [vmem:[%s2015_s22 + $0xa4] sm:$0x1] }
  0x48   : > { %v383_v54 = vmul.bf16 1045249613, %v239_v41  ;;  %v1167_v58 = vrot.slane %v1165_v11, 4  ;;  %vm311_vm11 = vcmp.gt.bf16.partialorder %v239_v41, 0  ;;  %vm309_vm12 = vcmp.gt.bf16.partialorder %v237_v23, 0 }
  0x49   : > { %v2284_v20 = vsel %vm2170_vm13, %v830_v31, %v834_v35  ;;  %v1170_v33 = vrot.slane %v1168_v42, 5  ;;  %v1153_v60 = vrot.slane %v1151_v43, 4  ;;  %v1156_v34 = vrot.slane %v1154_v44, 5  ;;  %v257_v43 = vld [vmem:[%s2015_s22 + $0xe4] sm:$0x1] }
  0x4a   : > { %vm318_vm14 = vcmp.gt.bf16.partialorder %v246_v50, 0  ;;  %v977_v2 = vshll.u32 %v443_v53, 16  ;;  %v455_v3 = vsel %vm311_vm11, %v239_v41, %v383_v54  ;;  %v1196_v8 = vshll.u32 %v2090_v39, 16  ;;  %v248_v41 = vld [vmem:[%s2015_s22 + $0xc0] sm:$0xf] }
  0x4b   : > { %736 = vrot.lane.b32.xlu1 %v2165_v48, %s1957_s29  ;;  %734 = vrot.lane.b32.xlu0 %v2109_v51, %s1957_s29  ;;  %v1179_v10 = vshrl.u32 %v2092_v40, 16  ;;  %v1157_v13 = vor.u32 %v1156_v34, %v1153_v60  ;;  %v1182_v14 = vshll.u32 %v2092_v40, 16  ;;  %v1171_v16 = vor.u32 %v1170_v33, %v1167_v58  ;;  %v255_v44 = vld [vmem:[%s2015_s22 + $0xdc] sm:$0x1]  ;;  %v264_v54 = vld [vmem:[%s2015_s22 + $0x100] sm:$0xf] }
  0x4c   : > { %v979_v24 = vrot.slane %v977_v2, 5  ;;  %v1174_v25 = vshll.u32 %v455_v3, 16  ;;  %vm529_vm15 = vcmask 60448   ;;  %v2316_v18 = vrot.slane %v1196_v8, 5 }
  0x4d   : > { %v1310_v40 = vshrl.u32 %v2101_v46, 16  ;;  %v1313_v22 = vshll.u32 %v2101_v46, 16  ;;  %v2321_v30 = vrot.slane %v1179_v10, 4  ;;  %v2323_v31 = vrot.slane %v1182_v14, 5 }
  0x4e   : > { %v1172_v35 = vrot.slane %v1171_v16, 4  ;;  %v1158_v36 = vrot.slane %v1157_v13, 4  ;;  %v1176_v46 = vrot.slane %v1174_v25, 5  ;;  %v1296_v11 = vshrl.u32 %v2103_v47, 16 }
  0x4f   : > { %880 = vrot.lane.b32.xlu1 %v2187_v1, %s1958_s30  ;;  %878 = vrot.lane.b32.xlu0 %v779_v4, %s1958_s30  ;;  %v961_v4 = vrot.slane %v960_v63, 4  ;;  %v1299_v42 = vshll.u32 %v2103_v47, 16  ;;  %vm313_vm1 = vcmp.gt.bf16.partialorder %v241_v29, 0  ;;  %v392_v53 = vmul.bf16 1045249613, %v248_v41 }
  0x50   : > { %vm320_vm3 = vcmp.gt.bf16.partialorder %v248_v41, 0  ;;  %v401_v34 = vmul.bf16 1045249613, %v257_v43  ;;  %vm329_vm4 = vcmp.gt.bf16.partialorder %v257_v43, 0  ;;  %vm327_vm5 = vcmp.gt.bf16.partialorder %v255_v44, 0 }
  0x51   : > { %v2258_v17 = vsel %vm2170_vm13, %v961_v4, %v965_v6  ;;  %v1193_v6 = vshrl.u32 %v2090_v39, 16  ;;  %v243_v39 = vld [vmem:[%s2015_s22 + $0xac] sm:$0x1]  ;;  %v408_v2 = vmul.bf16 1045249613, %v264_v54  ;;  %v2369_v10 = vsel %vm320_vm3, %v248_v41, %v392_v53 }
  0x52   : > { %v387_v38 = vmul.bf16 1045249613, %v243_v39  ;;  %vm315_vm0 = vcmp.gt.bf16.partialorder %v243_v39, 0  ;;  %vm336_vm6 = vcmp.gt.bf16.partialorder %v264_v54, 0  ;;  %vm570_vm7 = vcmask 93248  }
  0x53   : > { %515 = vrot.lane.b32.xlu1 %v2200_v15, %s1951_s23  ;;  %513 = vrot.lane.b32.xlu0 %v2072_v28, %s1951_s23  ;;  %v2314_v5 = vrot.slane %v1193_v6, 4  ;;  %v1185_v6 = vor.u32 %v2323_v31, %v2321_v30  ;;  %v1338_v31 = vshrl.u32 %v2109_v51, 16  ;;  %vm720_vm3 = vcmask 224448  }
  0x55   : > { %v1199_v3 = vor.u32 %v2316_v18, %v2314_v5  ;;  %v1186_v18 = vrot.slane %v1185_v6, 4 }
  0x57   : > { %884 = vrot.lane.b32.xlu1 %v2221_v19, %s1958_s30  ;;  %882 = vrot.lane.b32.xlu0 %v807_v37, %s1958_s30 }
  0x5b   : > { %1025 = vrot.lane.b32.xlu1 %v2234_v56, %s1959_s5  ;;  %1023 = vrot.lane.b32.xlu0 %v924_v57, %s1959_s5  ;;  %v381_v57 = vmul.bf16 1045249613, %v237_v23 }
  0x5d   : > { %v453_v4 = vsel %vm309_vm12, %v237_v23, %v381_v57  ;;  %v385_v23 = vmul.bf16 1045249613, %v241_v29  ;;  %v459_v57 = vsel %vm315_vm0, %v243_v39, %v387_v38  ;;  %v1200_v39 = vrot.slane %v1199_v3, 4  ;;  %v259_v38 = vld [vmem:[%s2015_s22 + $0xec] sm:$0x1] }
  0x5e   : > { %v1160_v26 = vshll.u32 %v453_v4, 16  ;;  %v1202_v4 = vshll.u32 %v459_v57, 16  ;;  %vm331_vm9 = vcmp.gt.bf16.partialorder %v259_v38, 0 }
  0x5f   : > { %519 = vrot.lane.b32.xlu1 %v2241_v61, %s1951_s23  ;;  %517 = vrot.lane.b32.xlu0 %v2243_v62, %s1951_s23  ;;  %v457_v60 = vsel %vm313_vm1, %v241_v29, %v385_v23  ;;  %v268_v23 = vld [vmem:[%s2015_s22 + $0x110] sm:$0xf]  ;;  %vm686_vm1 = vcmask 191648  }
  0x60   : > { %v1162_v7 = vrot.slane %v1160_v26, 5  ;;  %v1188_v13 = vshll.u32 %v457_v60, 16  ;;  %v2377_v26 = vsel %vm336_vm6, %v264_v54, %v408_v2  ;;  %v1204_v5 = vrot.slane %v1202_v4, 5 }
  0x61   : > { %v403_v54 = vmul.bf16 1045249613, %v259_v38  ;;  %v412_v60 = vmul.bf16 1045249613, %v268_v23  ;;  %vm340_vm11 = vcmp.gt.bf16.partialorder %v268_v23, 0  ;;  %vm754_vm6 = vcmask 257248  }
  0x62   : > { %v1163_v47 = vsel %vm2170_vm13, %v1158_v36, %v1162_v7  ;;  %v1324_v7 = vshrl.u32 %v2111_v52, 16 }
  0x63   : > { %556 = vrot.lane.b32.xlu1 %v2176_v59, %s1952_s24  ;;  %554 = vrot.lane.b32.xlu0 %v2193_v9, %s1952_s24  ;;  %v475_v4 = vsel %vm331_vm9, %v259_v38, %v403_v54  ;;  %v2420_v6 = vsel %vm340_vm11, %v268_v23, %v412_v60 }
  0x67   : > { %1029 = vrot.lane.b32.xlu1 %v2258_v17, %s1959_s5  ;;  %1027 = vrot.lane.b32.xlu0 %v952_v21, %s1959_s5 }
  0x6b   : > { %1072 = vrot.lane.b32.xlu1 %v807_v37, %s1960_s6  ;;  %1070 = vrot.lane.b32.xlu0 %v2187_v1, %s1960_s6  ;;  %v968_v1 = vshrl.u32 %v2072_v28, 16  ;;  %v234_v37 = vld [vmem:[%s2015_s22 + $0x88] sm:$0xf] }
  0x6c   : > { %v378_v49 = vmul.bf16 1045249613, %v234_v37  ;;  %vm306_vm10 = vcmp.gt.bf16.partialorder %v234_v37, 0 }
  0x6d   : > { %v970_v28 = vrot.slane %v968_v1, 4 }
  0x6e   : > { %v2301_v63 = vsel %vm306_vm10, %v234_v37, %v378_v49  ;;  %v250_v37 = vld [vmem:[%s2015_s22 + $0xc8] sm:$0xf]  ;;  %vm604_vm10 = vcmask 126048  }
  0x6f   : > { %560 = vrot.lane.b32.xlu1 %v2269_v27, %s1952_s24  ;;  %558 = vrot.lane.b32.xlu0 %v2211_v32, %s1952_s24  ;;  %v974_v0 = vor.u32 %v973_v45, %v970_v28  ;;  %v2339_v28 = vrot.slane %v1310_v40, 4  ;;  %v2341_v45 = vrot.slane %v1313_v22, 5  ;;  %vm322_vm2 = vcmp.gt.bf16.partialorder %v250_v37, 0 }
  0x70   : > { %v394_v49 = vmul.bf16 1045249613, %v250_v37  ;;  %v1190_v40 = vrot.slane %v1188_v13, 5 }
  0x71   : > { %v1316_v22 = vor.u32 %v2341_v45, %v2339_v28  ;;  %v1340_v45 = vrot.slane %v1338_v31, 4  ;;  %v245_v31 = vld [vmem:[%s2015_s22 + $0xb4] sm:$0x1] }
  0x72   : > { %v2366_v8 = vsel %vm322_vm2, %v250_v37, %v394_v49  ;;  %v261_v37 = vld [vmem:[%s2015_s22 + $0xf4] sm:$0x1]  ;;  %vm317_vm0 = vcmp.gt.bf16.partialorder %v245_v31, 0 }
  0x73   : > { %590 = vrot.lane.b32.xlu1 %v2243_v62, %s1953_s25  ;;  %588 = vrot.lane.b32.xlu0 %v2200_v15, %s1953_s25  ;;  %v405_v53 = vmul.bf16 1045249613, %v261_v37  ;;  %vm333_vm8 = vcmp.gt.bf16.partialorder %v261_v37, 0 }
  0x75   : > { %v477_v3 = vsel %vm333_vm8, %v261_v37, %v405_v53 }
  0x77   : > { %1076 = vrot.lane.b32.xlu1 %v2284_v20, %s1960_s6  ;;  %1074 = vrot.lane.b32.xlu0 %v2221_v19, %s1960_s6  ;;  %v390_v19 = vmul.bf16 1045249613, %v246_v50 }
  0x7b   : > { %1119 = vrot.lane.b32.xlu1 %v952_v21, %s1961_s7  ;;  %1117 = vrot.lane.b32.xlu0 %v2234_v56, %s1961_s7  ;;  %v2311_v56 = vsel %vm318_vm14, %v246_v50, %v390_v19  ;;  %v975_v21 = vrot.slane %v974_v0, 4  ;;  %v2349_v50 = vsel %vm2170_vm13, %v1172_v35, %v1176_v46  ;;  %v1298_v19 = vrot.slane %v1296_v11, 4 }
  0x7c   : > { %v1301_v0 = vrot.slane %v1299_v42, 5  ;;  %v1341_v46 = vshll.u32 %v2109_v51, 16  ;;  %v1327_v11 = vshll.u32 %v2111_v52, 16  ;;  %v2395_v51 = vsel %vm2170_vm13, %v1200_v39, %v1204_v5  ;;  %v266_v52 = vld [vmem:[%s2015_s22 + $0x108] sm:$0xf] }
  0x7d   : > { %v2331_v1 = vsel %vm2170_vm13, %v975_v21, %v979_v24  ;;  %v473_v21 = vsel %vm329_vm4, %v257_v43, %v401_v34  ;;  %v2400_v42 = vsel %vm2170_vm13, %v1186_v18, %v1190_v40  ;;  %v1317_v43 = vrot.slane %v1316_v22, 4 }
  0x7e   : > { %v1302_v25 = vor.u32 %v1301_v0, %v1298_v19  ;;  %v1319_v29 = vshll.u32 %v473_v21, 16  ;;  %v1343_v57 = vrot.slane %v1341_v46, 5  ;;  %v410_v34 = vmul.bf16 1045249613, %v266_v52 }
  0x7f   : > { %594 = vrot.lane.b32.xlu1 %v2301_v63, %s1953_s25  ;;  %592 = vrot.lane.b32.xlu0 %v2241_v61, %s1953_s25  ;;  %vm338_vm12 = vcmp.gt.bf16.partialorder %v266_v52, 0  ;;  %vm645_vm14 = vcmask 158848  }
  0x80   : > { %v1303_v41 = vrot.slane %v1302_v25, 4  ;;  %v2422_v13 = vsel %vm338_vm12, %v266_v52, %v410_v34 }
  0x83   : > { %631 = vrot.lane.b32.xlu1 %v2311_v56, %s1954_s26  ;;  %629 = vrot.lane.b32.xlu0 %v2137_v12, %s1954_s26 }
  0x87   : > { %1123 = vrot.lane.b32.xlu1 %v2331_v1, %s1961_s7  ;;  %1121 = vrot.lane.b32.xlu0 %v2258_v17, %s1961_s7  ;;  %v399_v17 = vmul.bf16 1045249613, %v255_v44 }
  0x89   : > { %v510_v58 = vpop.permute.xlu1 %509  ;;  %v506_v33 = vpop.permute.xlu0 %505  ;;  %v471_v24 = vsel %vm327_vm5, %v255_v44, %v399_v17  ;;  %v1321_v44 = vrot.slane %v1319_v29, 5 }
  0x8a   : > { %532 = vst.msk [vmem:[#allocation2 + $0x8] sm:$0xf] %vm529_vm15, %v510_v58  ;;  %530 = vst.msk [vmem:[#allocation2] sm:$0xf] %vm529_vm15, %v506_v33  ;;  %v1305_v30 = vshll.u32 %v471_v24, 16  ;;  %v1326_v58 = vrot.slane %v1324_v7, 4 }
  0x8b   : > { %1264 = vrot.lane.b32.xlu1 %v2349_v50, %s1962_s8  ;;  %1262 = vrot.lane.b32.xlu0 %v1163_v47, %s1962_s8  ;;  %v1329_v33 = vrot.slane %v1327_v11, 5  ;;  %v2411_v17 = vsel %vm2170_vm13, %v1317_v43, %v1321_v44  ;;  %v1333_v24 = vshll.u32 %v475_v4, 16  ;;  %v252_v11 = vld [vmem:[%s2015_s22 + $0xd0] sm:$0xf] }
  0x8c   : > { %v1307_v28 = vrot.slane %v1305_v30, 5  ;;  %v396_v43 = vmul.bf16 1045249613, %v252_v11  ;;  %vm324_vm2 = vcmp.gt.bf16.partialorder %v252_v11, 0 }
  0x8d   : > { %v512_v14 = vpop.permute.xlu1 %511  ;;  %v508_v16 = vpop.permute.xlu0 %507  ;;  %v1330_v21 = vor.u32 %v1329_v33, %v1326_v58  ;;  %v1335_v22 = vrot.slane %v1333_v24, 5  ;;  %v837_v58 = vshrl.u32 %v2193_v9, 16  ;;  %v840_v33 = vshll.u32 %v2193_v9, 16  ;;  %v1933_v9 = vld [vmem:[%s2875_s1] sm:$0xff]   ;;  %v270_v24 = vld [vmem:[%s2015_s22 + $0x118] sm:$0xf] }
  0x8e   : > { %533 = vst.msk [vmem:[#allocation2 + $0xc] sm:$0xf] %vm529_vm15, %v512_v14  ;;  %531 = vst.msk [vmem:[#allocation2 + $0x4] sm:$0xf] %vm529_vm15, %v508_v16  ;;  %v1308_v19 = vsel %vm2170_vm13, %v1303_v41, %v1307_v28  ;;  %v1344_v14 = vor.u32 %v1343_v57, %v1340_v45  ;;  %v1347_v16 = vshll.u32 %v477_v3, 16  ;;  %v2460_v45 = vsel %vm324_vm2, %v252_v11, %v396_v43 }
  0x8f   : > { %635 = vrot.lane.b32.xlu1 %v2366_v8, %s1954_s26  ;;  %633 = vrot.lane.b32.xlu0 %v2369_v10, %s1954_s26  ;;  %v1331_v40 = vrot.slane %v1330_v21, 4  ;;  %v389_v41 = vmul.bf16 1045249613, %v245_v31  ;;  %v211_v57 = vld [vmem:[%s2015_s22 + $0x2c] sm:$0x1]  ;;  %v839_v4 = vrot.slane %v837_v58, 4 }
  0x90   : > { %v1345_v5 = vrot.slane %v1344_v14, 4  ;;  %v1349_v18 = vrot.slane %v1347_v16, 5  ;;  %vm283_vm4 = vcmp.gt.bf16.partialorder %v211_v57, 0  ;;  %v263_v3 = vld [vmem:[%s2015_s22 + $0xfc] sm:$0x1]  ;;  %1881 = vmatprep.subr.bf16.mxu0 %v1933_v9  ;;  %1897 = vmatprep.subr.bf16.mxu1 %v1933_v9  ;;  %vm342_vm8 = vcmp.gt.bf16.partialorder %v270_v24, 0 }
  0x91   : > { %v549_v35 = vpop.permute.xlu1 %548  ;;  %v547_v36 = vpop.permute.xlu0 %546  ;;  %v2445_v7 = vsel %vm2170_vm13, %v1331_v40, %v1335_v22  ;;  %v461_v52 = vsel %vm317_vm0, %v245_v31, %v389_v41  ;;  %v407_v22 = vmul.bf16 1045249613, %v263_v3  ;;  %1882 = vmatpush3.bf16.msra.mxu0 %v1933_v9  ;;  %1901 = vmatpush3.bf16.msra.mxu1 %v1933_v9  ;;  %v851_v31 = vshrl.u32 %v2176_v59, 16  ;;  %v1937_v9 = vld [vmem:[%s2875_s1 + $0x18] sm:$0xff]  }
  0x92   : > { %572 = vst.msk [vmem:[#allocation2 + $0x4] sm:$0xf] %vm570_vm7, %v549_v35  ;;  %571 = vst.msk [vmem:[#allocation2] sm:$0xf] %vm570_vm7, %v547_v36  ;;  %v1207_v35 = vshrl.u32 %v2137_v12, 16  ;;  %v1210_v36 = vshll.u32 %v2137_v12, 16  ;;  %v2441_v46 = vsel %vm2170_vm13, %v1345_v5, %v1349_v18 }
  0x93   : > { %672 = vrot.lane.b32.xlu1 %v2377_v26, %s1955_s27  ;;  %670 = vrot.lane.b32.xlu0 %v2165_v48, %s1955_s27  ;;  %vm335_vm5 = vcmp.gt.bf16.partialorder %v263_v3, 0  ;;  %vm902_vm0 = vcmask 290048  }
  0x94   : > { %v1209_v12 = vrot.slane %v1207_v35, 4  ;;  %v1212_v23 = vrot.slane %v1210_v36, 5  ;;  %v865_v35 = vshrl.u32 %v2211_v32, 16  ;;  %v868_v36 = vshll.u32 %v2211_v32, 16 }
  0x95   : > { %v553_v49 = vpop.permute.xlu1 %552  ;;  %v551_v47 = vpop.permute.xlu0 %550 }
  0x96   : > { %574 = vst.msk [vmem:[#allocation2 + $0xc] sm:$0xf] %vm570_vm7, %v553_v49  ;;  %573 = vst.msk [vmem:[#allocation2 + $0x8] sm:$0xf] %vm570_vm7, %v551_v47  ;;  %v1213_v49 = vor.u32 %v1212_v23, %v1209_v12  ;;  %v1216_v47 = vshll.u32 %v461_v52, 16  ;;  %v985_v23 = vshll.u32 %v2200_v15, 16 }
  0x97   : > { %1268 = vrot.lane.b32.xlu1 %v2395_v51, %s1962_s8  ;;  %1266 = vrot.lane.b32.xlu0 %v2400_v42, %s1962_s8  ;;  %v2516_v52 = vrot.slane %v851_v31, 4 }
  0x98   : > { %v1214_v60 = vrot.slane %v1213_v49, 4  ;;  %v1218_v34 = vrot.slane %v1216_v47, 5  ;;  %v867_v49 = vrot.slane %v865_v35, 4  ;;  %v870_v47 = vrot.slane %v868_v36, 5 }
  0x99   : > { %v583_v0 = vpop.permute.xlu1 %582  ;;  %v581_v2 = vpop.permute.xlu0 %580 }
  0x9a   : > { %606 = vst.msk [vmem:[#allocation2 + $0x4] sm:$0xf] %vm604_vm10, %v583_v0  ;;  %605 = vst.msk [vmem:[#allocation2] sm:$0xf] %vm604_vm10, %v581_v2  ;;  %v355_v2 = vmul.bf16 1045249613, %v211_v57  ;;  %v2489_v21 = vsel %vm2170_vm13, %v1214_v60, %v1218_v34 }
  0x9b   : > { %1409 = vrot.lane.b32.xlu1 %v2411_v17, %s1963_s9  ;;  %1407 = vrot.lane.b32.xlu0 %v1308_v19, %s1963_s9  ;;  %v1013_v34 = vshll.u32 %v2241_v61, 16 }
  0x9c   : > { %v427_v40 = vsel %vm283_vm4, %v211_v57, %v355_v2 }
  0x9d   : > { %v587_v25 = vpop.permute.xlu1 %586  ;;  %v585_v39 = vpop.permute.xlu0 %584  ;;  %v846_v41 = vshll.u32 %v427_v40, 16  ;;  %v1015_v36 = vrot.slane %v1013_v34, 5 }
  0x9e   : > { %608 = vst.msk [vmem:[#allocation2 + $0xc] sm:$0xf] %vm604_vm10, %v587_v25  ;;  %607 = vst.msk [vmem:[#allocation2 + $0x8] sm:$0xf] %vm604_vm10, %v585_v39  ;;  %v215_v25 = vld [vmem:[%s2015_s22 + $0x3c] sm:$0x1] }
  0x9f   : > { %676 = vrot.lane.b32.xlu1 %v2420_v6, %s1955_s27  ;;  %674 = vrot.lane.b32.xlu0 %v2422_v13, %s1955_s27  ;;  %v982_v39 = vshrl.u32 %v2200_v15, 16  ;;  %v359_v12 = vmul.bf16 1045249613, %v215_v25  ;;  %vm287_vm9 = vcmp.gt.bf16.partialorder %v215_v25, 0  ;;  %v229_v15 = vld [vmem:[%s2015_s22 + $0x74] sm:$0x1] }
  0xa0   : > { %v373_v2 = vmul.bf16 1045249613, %v229_v15  ;;  %vm301_vm12 = vcmp.gt.bf16.partialorder %v229_v15, 0  ;;  %s1968_s27 = smov 80  }
  0xa1   : > { %v624_v29 = vpop.permute.xlu1 %623  ;;  %v622_v30 = vpop.permute.xlu0 %621 }
  0xa2   : > { %647 = vst.msk [vmem:[#allocation2 + $0x4] sm:$0xf] %vm645_vm14, %v624_v29  ;;  %646 = vst.msk [vmem:[#allocation2] sm:$0xf] %vm645_vm14, %v622_v30  ;;  %v213_v29 = vld [vmem:[%s2015_s22 + $0x34] sm:$0x1] }
  0xa3   : > { %706 = vrot.lane.b32.xlu1 %v2369_v10, %s1956_s28  ;;  %704 = vrot.lane.b32.xlu0 %v2311_v56, %s1956_s28  ;;  %v1934_v30 = vld [vmem:[%s2875_s1 + $0x8] sm:$0xff]   ;;  %v357_v32 = vmul.bf16 1045249613, %v213_v29  ;;  %vm285_vm11 = vcmp.gt.bf16.partialorder %v213_v29, 0 }
  0xa4   : > { %1883 = vmatprep.subr.bf16.mxu0 %v1934_v30  ;;  %1898 = vmatprep.subr.bf16.mxu1 %v1934_v30 }
  0xa5   : > { %v628_v37 = vpop.permute.xlu1 %627  ;;  %v626_v38 = vpop.permute.xlu0 %625  ;;  %1884 = vmatpush3.bf16.msra.mxu0 %v1934_v30  ;;  %1902 = vmatpush3.bf16.msra.mxu1 %v1934_v30  ;;  %v429_v60 = vsel %vm285_vm11, %v213_v29, %v357_v32  ;;  %v445_v30 = vsel %vm301_vm12, %v229_v15, %v373_v2 }
  0xa6   : > { %649 = vst.msk [vmem:[#allocation2 + $0xc] sm:$0xf] %vm645_vm14, %v628_v37  ;;  %648 = vst.msk [vmem:[#allocation2 + $0x8] sm:$0xf] %vm645_vm14, %v626_v38  ;;  %v854_v37 = vshll.u32 %v2176_v59, 16 }
  0xa7   : > { %1413 = vrot.lane.b32.xlu1 %v2441_v46, %s1963_s9  ;;  %1411 = vrot.lane.b32.xlu0 %v2445_v7, %s1963_s9  ;;  %v414_v38 = vmul.bf16 1045249613, %v270_v24 }
  0xa9   : > { %v665_v44 = vpop.permute.xlu1 %664  ;;  %v663_v28 = vpop.permute.xlu0 %662 }
  0xaa   : > { %688 = vst.msk [vmem:[#allocation2 + $0x4] sm:$0xf] %vm686_vm1, %v665_v44  ;;  %687 = vst.msk [vmem:[#allocation2] sm:$0xf] %vm686_vm1, %v663_v28  ;;  %v479_v44 = vsel %vm335_vm5, %v263_v3, %v407_v22  ;;  %v2514_v28 = vrot.slane %v982_v39, 4  ;;  %v996_v3 = vshrl.u32 %v2243_v62, 16 }
  0xab   : > { %1456 = vrot.lane.b32.xlu1 %v2400_v42, %s1964_s10  ;;  %1454 = vrot.lane.b32.xlu0 %v2349_v50, %s1964_s10  ;;  %v1352_v50 = vshrl.u32 %v2165_v48, 16  ;;  %v1355_v42 = vshll.u32 %v2165_v48, 16  ;;  %v842_v48 = vrot.slane %v840_v33, 5  ;;  %v848_v33 = vrot.slane %v846_v41, 5 }
  0xad   : > { %v669_v53 = vpop.permute.xlu1 %668  ;;  %v667_v54 = vpop.permute.xlu0 %666  ;;  %v2483_v14 = vrot.slane %v1352_v50, 4  ;;  %v2485_v16 = vrot.slane %v1355_v42, 5  ;;  %v843_v11 = vor.u32 %v842_v48, %v839_v4  ;;  %v1361_v50 = vshll.u32 %v479_v44, 16  ;;  %v233_v48 = vld [vmem:[%s2015_s22 + $0x84] sm:$0x1] }
  0xae   : > { %690 = vst.msk [vmem:[#allocation2 + $0xc] sm:$0xf] %vm686_vm1, %v669_v53  ;;  %689 = vst.msk [vmem:[#allocation2 + $0x8] sm:$0xf] %vm686_vm1, %v667_v54  ;;  %v856_v53 = vrot.slane %v854_v37, 5  ;;  %v2526_v54 = vsel %vm342_vm8, %v270_v24, %v414_v38  ;;  %v431_v42 = vsel %vm287_vm9, %v215_v25, %v359_v12  ;;  %v871_v4 = vor.u32 %v870_v47, %v867_v49 }
  0xaf   : > { %710 = vrot.lane.b32.xlu1 %v2460_v45, %s1956_s28  ;;  %708 = vrot.lane.b32.xlu0 %v2366_v8, %s1956_s28  ;;  %v844_v57 = vrot.slane %v843_v11, 4  ;;  %v1358_v58 = vor.u32 %v2485_v16, %v2483_v14  ;;  %v231_v14 = vld [vmem:[%s2015_s22 + $0x7c] sm:$0x1]  ;;  %v860_v24 = vshll.u32 %v429_v60, 16  ;;  %v999_v25 = vshll.u32 %v2243_v62, 16  ;;  %s1969_s28 = smov 112  }
  0xb0   : > { %v857_v16 = vor.u32 %v856_v53, %v2516_v52  ;;  %v377_v31 = vmul.bf16 1045249613, %v233_v48  ;;  %v375_v35 = vmul.bf16 1045249613, %v231_v14  ;;  %v872_v62 = vrot.slane %v871_v4, 4 }
  0xb1   : > { %v699_v19 = vpop.permute.xlu1 %698  ;;  %v697_v0 = vpop.permute.xlu0 %696  ;;  %v2552_v39 = vsel %vm2170_vm13, %v844_v57, %v848_v33  ;;  %vm305_vm2 = vcmp.gt.bf16.partialorder %v233_v48, 0  ;;  %vm303_vm4 = vcmp.gt.bf16.partialorder %v231_v14, 0  ;;  %v862_v11 = vrot.slane %v860_v24, 5 }
  0xb2   : > { %722 = vst.msk [vmem:[#allocation2 + $0x4] sm:$0xf] %vm720_vm3, %v699_v19  ;;  %721 = vst.msk [vmem:[#allocation2] sm:$0xf] %vm720_vm3, %v697_v0  ;;  %v858_v38 = vrot.slane %v857_v16, 4  ;;  %v998_v12 = vrot.slane %v996_v3, 4  ;;  %v447_v52 = vsel %vm303_vm4, %v231_v14, %v375_v35 }
  0xb3   : > { %740 = vrot.lane.b32.xlu1 %v2422_v13, %s1957_s29  ;;  %738 = vrot.lane.b32.xlu0 %v2377_v26, %s1957_s29  ;;  %v1001_v32 = vrot.slane %v999_v25, 5  ;;  %v1060_v49 = vshll.u32 %v2269_v27, 16  ;;  %vm1047_vm8 = vcmask 322848   ;;  %v1104_v14 = vshrl.u32 %v2301_v63, 16  ;;  %v235_v16 = vld [vmem:[%s2015_s22 + $0x8c] sm:$0x1] }
  0xb4   : > { %v2582_v15 = vsel %vm2170_vm13, %v858_v38, %v862_v11  ;;  %vm307_vm9 = vcmp.gt.bf16.partialorder %v235_v16, 0  ;;  %v1224_v35 = vshll.u32 %v2311_v56, 16 }
  0xb5   : > { %v703_v5 = vpop.permute.xlu1 %702  ;;  %v701_v18 = vpop.permute.xlu0 %700  ;;  %v1002_v33 = vor.u32 %v1001_v32, %v998_v12  ;;  %v251_v12 = vld [vmem:[%s2015_s22 + $0xcc] sm:$0x1] }
  0xb6   : > { %724 = vst.msk [vmem:[#allocation2 + $0xc] sm:$0xf] %vm720_vm3, %v703_v5  ;;  %723 = vst.msk [vmem:[#allocation2 + $0x8] sm:$0xf] %vm720_vm3, %v701_v18  ;;  %v1359_v5 = vrot.slane %v1358_v58, 4  ;;  %v1363_v18 = vrot.slane %v1361_v50, 5 }
  0xb7   : > { %1460 = vrot.lane.b32.xlu1 %v2489_v21, %s1964_s10  ;;  %1458 = vrot.lane.b32.xlu0 %v2395_v51, %s1964_s10  ;;  %v1936_v51 = vld [vmem:[%s2875_s1 + $0x10] sm:$0xff]   ;;  %v1005_v50 = vshll.u32 %v447_v52, 16  ;;  %v1003_v2 = vrot.slane %v1002_v33, 4  ;;  %v1235_v52 = vshrl.u32 %v2369_v10, 16  ;;  %vm323_vm11 = vcmp.gt.bf16.partialorder %v251_v12, 0 }
  0xb8   : > { %1885 = vmatprep.subr.bf16.mxu0 %v1936_v51  ;;  %1899 = vmatprep.subr.bf16.mxu1 %v1936_v51 }
  0xb9   : > { %v733_v43 = vpop.permute.xlu1 %732  ;;  %v731_v59 = vpop.permute.xlu0 %730  ;;  %1886 = vmatpush3.bf16.msra.mxu0 %v1936_v51  ;;  %1903 = vmatpush3.bf16.msra.mxu1 %v1936_v51  ;;  %v449_v51 = vsel %vm305_vm2, %v233_v48, %v377_v31  ;;  %v1221_v31 = vshrl.u32 %v2311_v56, 16  ;;  %v249_v56 = vld [vmem:[%s2015_s22 + $0xc4] sm:$0x1]  ;;  %vm1094_vm2 = vcmask 355648  }
  0xba   : > { %756 = vst.msk [vmem:[#allocation2 + $0x4] sm:$0xf] %vm754_vm6, %v733_v43  ;;  %755 = vst.msk [vmem:[#allocation2] sm:$0xf] %vm754_vm6, %v731_v59  ;;  %1887 = vmatprep.subr.bf16.mxu0 %v1937_v9  ;;  %1900 = vmatprep.subr.bf16.mxu1 %v1937_v9  ;;  %v991_v43 = vshll.u32 %v445_v30, 16  ;;  %v1019_v58 = vshll.u32 %v449_v51, 16 }
  0xbb   : > { %1503 = vrot.lane.b32.xlu1 %v2445_v7, %s1965_s17  ;;  %1501 = vrot.lane.b32.xlu0 %v2411_v17, %s1965_s17  ;;  %v2532_v7 = vrot.slane %v985_v23, 5  ;;  %v1010_v17 = vshrl.u32 %v2241_v61, 16  ;;  %v874_v61 = vshll.u32 %v431_v42, 16  ;;  %v2565_v23 = vsel %vm2170_vm13, %v1359_v5, %v1363_v18 }
  0xbc   : > { %v993_v57 = vrot.slane %v991_v43, 5  ;;  %v1249_v43 = vshrl.u32 %v2366_v8, 16  ;;  %v1252_v51 = vshll.u32 %v2366_v8, 16  ;;  %v393_v33 = vmul.bf16 1045249613, %v249_v56 }
  0xbd   : > { %v737_v19 = vpop.permute.xlu1 %736  ;;  %v735_v0 = vpop.permute.xlu0 %734  ;;  %v1012_v40 = vrot.slane %v1010_v17, 4  ;;  %1888 = vmatpush3.bf16.msra.mxu0 %v1937_v9  ;;  %1904 = vmatpush3.bf16.msra.mxu1 %v1937_v9  ;;  %v876_v37 = vrot.slane %v874_v61, 5  ;;  %v988_v41 = vor.u32 %v2532_v7, %v2514_v28  ;;  %v217_v28 = vld [vmem:[%s2015_s22 + $0x44] sm:$0x1]  ;;  %v1062_v17 = vrot.slane %v1060_v49, 5 }
  0xbe   : > { %758 = vst.msk [vmem:[#allocation2 + $0xc] sm:$0xf] %vm754_vm6, %v737_v19  ;;  %757 = vst.msk [vmem:[#allocation2 + $0x8] sm:$0xf] %vm754_vm6, %v735_v0  ;;  %v361_v7 = vmul.bf16 1045249613, %v217_v28 }
  0xbf   : > { %744 = vrot.lane.b32.xlu1 %v2526_v54, %s1957_s29  ;;  %742 = vrot.lane.b32.xlu0 %v2420_v6, %s1957_s29  ;;  %v2578_v47 = vsel %vm2170_vm13, %v872_v62, %v876_v37  ;;  %v1016_v53 = vor.u32 %v1015_v36, %v1012_v40  ;;  %vm289_vm5 = vcmp.gt.bf16.partialorder %v217_v28, 0  ;;  %v1021_v0 = vrot.slane %v1019_v58, 5 }
  0xc0   : > { %v1007_v9 = vrot.slane %v1005_v50, 5  ;;  %v433_v48 = vsel %vm289_vm5, %v217_v28, %v361_v7  ;;  %v1107_v61 = vshll.u32 %v2301_v63, 16  ;;  %vm321_vm12 = vcmp.gt.bf16.partialorder %v249_v56, 0 }
  0xc1   : > { %v881_v22 = vpop.permute.xlu1 %880  ;;  %v879_v29 = vpop.permute.xlu0 %878  ;;  %v1017_v34 = vrot.slane %v1016_v53, 4  ;;  %v1066_v5 = vshll.u32 %v433_v48, 16  ;;  %v1366_v53 = vshrl.u32 %v2377_v26, 16 }
  0xc2   : > { %904 = vst.msk [vmem:[#allocation2 + $0x4] sm:$0xf] %vm902_vm0, %v881_v22  ;;  %903 = vst.msk [vmem:[#allocation2] sm:$0xf] %vm902_vm0, %v879_v29  ;;  %v2609_v63 = vsel %vm2170_vm13, %v1003_v2, %v1007_v9  ;;  %v379_v22 = vmul.bf16 1045249613, %v235_v16 }
  0xc3   : > { %888 = vrot.lane.b32.xlu1 %v2552_v39, %s1958_s30  ;;  %886 = vrot.lane.b32.xlu0 %v2284_v20, %s1958_s30  ;;  %v1057_v20 = vshrl.u32 %v2269_v27, 16  ;;  %v989_v27 = vrot.slane %v988_v41, 4  ;;  %v2605_v25 = vsel %vm2170_vm13, %v1017_v34, %v1021_v0  ;;  %v1106_v29 = vrot.slane %v1104_v14, 4  ;;  %v269_v14 = vld [vmem:[%s2015_s22 + $0x114] sm:$0x1] }
  0xc4   : > { %v1109_v30 = vrot.slane %v1107_v61, 5  ;;  %v1068_v62 = vrot.slane %v1066_v5, 5  ;;  %v451_v11 = vsel %vm307_vm9, %v235_v16, %v379_v22  ;;  %v1368_v0 = vrot.slane %v1366_v53, 4 }
  0xc5   : > { %v516_v59 = vpop.permute.xlu1 %515  ;;  %v514_v44 = vpop.permute.xlu0 %513  ;;  %v2592_v19 = vsel %vm2170_vm13, %v989_v27, %v993_v57  ;;  %v1113_v28 = vshll.u32 %v451_v11, 16  ;;  %v395_v27 = vmul.bf16 1045249613, %v251_v12  ;;  %v1394_v2 = vshrl.u32 %v2420_v6, 16 }
  0xc6   : > { %535 = vst.msk [vmem:[#allocation2 + $0x14] sm:$0xf] %vm529_vm15, %v516_v59  ;;  %534 = vst.msk [vmem:[#allocation2 + $0x10] sm:$0xf] %vm529_vm15, %v514_v44  ;;  %v1110_v32 = vor.u32 %v1109_v30, %v1106_v29  ;;  %v1223_v59 = vrot.slane %v1221_v31, 4  ;;  %v1226_v44 = vrot.slane %v1224_v35, 5 }
  0xc7   : > { %1507 = vrot.lane.b32.xlu1 %v2565_v23, %s1965_s17  ;;  %1505 = vrot.lane.b32.xlu0 %v2441_v46, %s1965_s17  ;;  %v1059_v46 = vrot.slane %v1057_v20, 4  ;;  %v1238_v20 = vshll.u32 %v2369_v10, 16  ;;  %v265_v10 = vld [vmem:[%s2015_s22 + $0x104] sm:$0x1]  ;;  %v467_v34 = vsel %vm323_vm11, %v251_v12, %v395_v27  ;;  %v1380_v16 = vshrl.u32 %v2422_v13, 16 }
  0xc8   : > { %v1111_v50 = vrot.slane %v1110_v32, 4  ;;  %v1227_v7 = vor.u32 %v1226_v44, %v1223_v59  ;;  %v409_v48 = vmul.bf16 1045249613, %v265_v10  ;;  %vm337_vm4 = vcmp.gt.bf16.partialorder %v265_v10, 0 }
  0xc9   : > { %v885_v42 = vpop.permute.xlu1 %884  ;;  %v883_v60 = vpop.permute.xlu0 %882  ;;  %v1063_v24 = vor.u32 %v1062_v17, %v1059_v46  ;;  %v1240_v46 = vrot.slane %v1238_v20, 5  ;;  %v1115_v17 = vrot.slane %v1113_v28, 5  ;;  %v1383_v5 = vshll.u32 %v2422_v13, 16 }
  0xca   : > { %906 = vst.msk [vmem:[#allocation2 + $0xc] sm:$0xf] %vm902_vm0, %v885_v42  ;;  %905 = vst.msk [vmem:[#allocation2 + $0x8] sm:$0xf] %vm902_vm0, %v883_v60  ;;  %v1369_v42 = vshll.u32 %v2377_v26, 16  ;;  %v1237_v60 = vrot.slane %v1235_v52, 4 }
  0xcb   : > { %892 = vrot.lane.b32.xlu1 %v2578_v47, %s1958_s30  ;;  %890 = vrot.lane.b32.xlu0 %v2582_v15, %s1958_s30  ;;  %v1064_v36 = vrot.slane %v1063_v24, 4  ;;  %v267_v24 = vld [vmem:[%s2015_s22 + $0x10c] sm:$0x1]  ;;  %v1258_v22 = vshll.u32 %v467_v34, 16  ;;  %v1396_v31 = vrot.slane %v1394_v2, 4  ;;  %vm341_vm5 = vcmp.gt.bf16.partialorder %v269_v14, 0 }
  0xcc   : > { %v1371_v61 = vrot.slane %v1369_v42, 5  ;;  %v1241_v30 = vor.u32 %v1240_v46, %v1237_v60  ;;  %v413_v13 = vmul.bf16 1045249613, %v269_v14  ;;  %vm339_vm9 = vcmp.gt.bf16.partialorder %v267_v24, 0 }
  0xcd   : > { %v1026_v3 = vpop.permute.xlu1 %1025  ;;  %v1024_v4 = vpop.permute.xlu0 %1023  ;;  %v1069_v49 = vsel %vm2170_vm13, %v1064_v36, %v1068_v62  ;;  %v481_v62 = vsel %vm337_vm4, %v265_v10, %v409_v48  ;;  %v1444_v28 = vshll.u32 %v2460_v45, 16  ;;  %v1491_v48 = vshll.u32 %v2526_v54, 16 }
  0xce   : > { %1049 = vst.msk [vmem:[#allocation2 + $0x4] sm:$0xf] %vm1047_vm8, %v1026_v3  ;;  %1048 = vst.msk [vmem:[#allocation2] sm:$0xf] %vm1047_vm8, %v1024_v4  ;;  %v465_v4 = vsel %vm321_vm12, %v249_v56, %v393_v33  ;;  %v1372_v12 = vor.u32 %v1371_v61, %v1368_v0  ;;  %v1375_v59 = vshll.u32 %v481_v62, 16  ;;  %v485_v52 = vsel %vm341_vm5, %v269_v14, %v413_v13 }
  0xcf   : > { %1033 = vrot.lane.b32.xlu1 %v2592_v19, %s1959_s5  ;;  %1031 = vrot.lane.b32.xlu0 %v2331_v1, %s1959_s5  ;;  %v247_v1 = vld [vmem:[%s2015_s22 + $0xbc] sm:$0x1]  ;;  %v1403_v33 = vshll.u32 %v485_v52, 16  ;;  %vm1773_vm12 = vcmask 523648   ;;  %vm1785_vm4 = vcmask 786048   ;;  %vm1791_vm5 = vcmask 917248  }
  0xd0   : > { %v391_v41 = vmul.bf16 1045249613, %v247_v1  ;;  %v1373_v53 = vrot.slane %v1372_v12, 4 }
  0xd1   : > { %v520_v18 = vpop.permute.xlu1 %519  ;;  %v518_v40 = vpop.permute.xlu0 %517  ;;  %v1405_v46 = vrot.slane %v1403_v33, 5 }
  0xd2   : > { %537 = vst.msk [vmem:[#allocation2 + $0x1c] sm:$0xf] %vm529_vm15, %v520_v18  ;;  %536 = vst.msk [vmem:[#allocation2 + $0x18] sm:$0xf] %vm529_vm15, %v518_v40  ;;  %vm319_vm15 = vcmp.gt.bf16.partialorder %v247_v1, 0  ;;  %v1228_v18 = vrot.slane %v1227_v7, 4 }
  0xd3   : > { %1037 = vrot.lane.b32.xlu1 %v2605_v25, %s1959_s5  ;;  %1035 = vrot.lane.b32.xlu0 %v2609_v63, %s1959_s5  ;;  %v463_v58 = vsel %vm319_vm15, %v247_v1, %v391_v41  ;;  %v1244_v1 = vshll.u32 %v465_v4, 16  ;;  %v1260_v41 = vrot.slane %v1258_v22, 5  ;;  %vm1141_vm15 = vcmask 388448  }
  0xd4   : > { %v1230_v26 = vshll.u32 %v463_v58, 16  ;;  %v1377_v58 = vrot.slane %v1375_v59, 5  ;;  %v1488_v4 = vshrl.u32 %v2526_v54, 16 }
  0xd5   : > { %v557_v37 = vpop.permute.xlu1 %556  ;;  %v555_v38 = vpop.permute.xlu0 %554  ;;  %v1246_v56 = vrot.slane %v1244_v1, 5 }
  0xd6   : > { %576 = vst.msk [vmem:[#allocation2 + $0x14] sm:$0xf] %vm570_vm7, %v557_v37  ;;  %575 = vst.msk [vmem:[#allocation2 + $0x10] sm:$0xf] %vm570_vm7, %v555_v38  ;;  %v1232_v29 = vrot.slane %v1230_v26, 5  ;;  %v1378_v7 = vsel %vm2170_vm13, %v1373_v53, %v1377_v58 }
  0xd7   : > { %1080 = vrot.lane.b32.xlu1 %v2582_v15, %s1960_s6  ;;  %1078 = vrot.lane.b32.xlu0 %v2552_v39, %s1960_s6  ;;  %v1251_v15 = vrot.slane %v1249_v43, 4  ;;  %v1254_v39 = vrot.slane %v1252_v51, 5  ;;  %v411_v37 = vmul.bf16 1045249613, %v267_v24  ;;  %v1242_v43 = vrot.slane %v1241_v30, 4 }
  0xd8   : > { %v2665_v32 = vsel %vm2170_vm13, %v1228_v18, %v1232_v29  ;;  %v1493_v18 = vrot.slane %v1491_v48, 5 }
  0xd9   : > { %v1030_v57 = vpop.permute.xlu1 %1029  ;;  %v1028_v8 = vpop.permute.xlu0 %1027  ;;  %v1255_v40 = vor.u32 %v1254_v39, %v1251_v15  ;;  %v483_v20 = vsel %vm339_vm9, %v267_v24, %v411_v37  ;;  %v1446_v39 = vrot.slane %v1444_v28, 5  ;;  %vm1797_vm9 = vcmask 1048448  }
  0xda   : > { %1051 = vst.msk [vmem:[#allocation2 + $0xc] sm:$0xf] %vm1047_vm8, %v1030_v57  ;;  %1050 = vst.msk [vmem:[#allocation2 + $0x8] sm:$0xf] %vm1047_vm8, %v1028_v8 }
  0xdb   : > { %1084 = vrot.lane.b32.xlu1 %v1069_v49, %s1960_s6  ;;  %1082 = vrot.lane.b32.xlu0 %v2578_v47, %s1960_s6  ;;  %v1397_v47 = vshll.u32 %v2420_v6, 16  ;;  %v1116_v6 = vsel %vm2170_vm13, %v1111_v50, %v1115_v17  ;;  %v1256_v11 = vrot.slane %v1255_v40, 4  ;;  %v1441_v49 = vshrl.u32 %v2460_v45, 16 }
  0xdc   : > { %v1247_v45 = vsel %vm2170_vm13, %v1242_v43, %v1246_v56  ;;  %v1389_v50 = vshll.u32 %v483_v20, 16 }
  0xdd   : > { %v1073_v9 = vpop.permute.xlu1 %1072  ;;  %v1071_v3 = vpop.permute.xlu0 %1070  ;;  %v1399_v38 = vrot.slane %v1397_v47, 5  ;;  %v2678_v27 = vsel %vm2170_vm13, %v1256_v11, %v1260_v41 }
  0xde   : > { %1096 = vst.msk [vmem:[#allocation2 + $0x4] sm:$0xf] %vm1094_vm2, %v1073_v9  ;;  %1095 = vst.msk [vmem:[#allocation2] sm:$0xf] %vm1094_vm2, %v1071_v3  ;;  %v1391_v26 = vrot.slane %v1389_v50, 5 }
  0xdf   : > { %1127 = vrot.lane.b32.xlu1 %v2609_v63, %s1961_s7  ;;  %1125 = vrot.lane.b32.xlu0 %v2592_v19, %s1961_s7  ;;  %v1382_v63 = vrot.slane %v1380_v16, 4  ;;  %v1385_v19 = vrot.slane %v1383_v5, 5  ;;  %v1400_v57 = vor.u32 %v1399_v38, %v1396_v31  ;;  %v271_v9 = vld [vmem:[%s2015_s22 + $0x11c] sm:$0x1] }
  0xe0   : > { %v415_v5 = vmul.bf16 1045249613, %v271_v9  ;;  %vm343_vm11 = vcmp.gt.bf16.partialorder %v271_v9, 0 }
  0xe1   : > { %v561_v35 = vpop.permute.xlu1 %560  ;;  %v559_v36 = vpop.permute.xlu0 %558  ;;  %v1386_v8 = vor.u32 %v1385_v19, %v1382_v63  ;;  %v1401_v60 = vrot.slane %v1400_v57, 4 }
  0xe2   : > { %578 = vst.msk [vmem:[#allocation2 + $0x1c] sm:$0xf] %vm570_vm7, %v561_v35  ;;  %577 = vst.msk [vmem:[#allocation2 + $0x18] sm:$0xf] %vm570_vm7, %v559_v36  ;;  %v487_v29 = vsel %vm343_vm11, %v271_v9, %v415_v5 }
  0xe3   : > { %1131 = vrot.lane.b32.xlu1 %v1116_v6, %s1961_s7  ;;  %1129 = vrot.lane.b32.xlu0 %v2605_v25, %s1961_s7  ;;  %v253_v25 = vld [vmem:[%s2015_s22 + $0xd4] sm:$0x1]  ;;  %v1387_v17 = vrot.slane %v1386_v8, 4  ;;  %v1406_v14 = vsel %vm2170_vm13, %v1401_v60, %v1405_v46  ;;  %v1497_v31 = vshll.u32 %v487_v29, 16  ;;  %s1858_s22 = sshll.u32 %s2882_s20, 3  ;;  %s1966_s20 = smov 64  }
  0xe4   : > { %v397_v10 = vmul.bf16 1045249613, %v253_v25  ;;  %vm325_vm7 = vcmp.gt.bf16.partialorder %v253_v25, 0  ;;  %s2852_s25 = scalar_lea.vmem %s2878_s4, %s1858_s22 }
  0xe5   : > { %v591_v44 = vpop.permute.xlu1 %590  ;;  %v589_v51 = vpop.permute.xlu0 %588  ;;  %v1392_v61 = vsel %vm2170_vm13, %v1387_v17, %v1391_v26  ;;  %v1499_v13 = vrot.slane %v1497_v31, 5 }
  0xe6   : > { %610 = vst.msk [vmem:[#allocation2 + $0x14] sm:$0xf] %vm604_vm10, %v591_v44  ;;  %609 = vst.msk [vmem:[#allocation2 + $0x10] sm:$0xf] %vm604_vm10, %v589_v51  ;;  %v469_v2 = vsel %vm325_vm7, %v253_v25, %v397_v10 }
  0xe7   : > { %1272 = vrot.lane.b32.xlu1 %v2665_v32, %s1962_s8  ;;  %1270 = vrot.lane.b32.xlu0 %v2489_v21, %s1962_s8  ;;  %v1443_v21 = vrot.slane %v1441_v49, 4  ;;  %v1450_v47 = vshll.u32 %v469_v2, 16 }
  0xe9   : > { %v1077_v15 = vpop.permute.xlu1 %1076  ;;  %v1075_v42 = vpop.permute.xlu0 %1074  ;;  %v1447_v3 = vor.u32 %v1446_v39, %v1443_v21  ;;  %v1452_v40 = vrot.slane %v1450_v47, 5 }
  0xea   : > { %1098 = vst.msk [vmem:[#allocation2 + $0xc] sm:$0xf] %vm1094_vm2, %v1077_v15  ;;  %1097 = vst.msk [vmem:[#allocation2 + $0x8] sm:$0xf] %vm1094_vm2, %v1075_v42 }
  0xeb   : > { %1276 = vrot.lane.b32.xlu1 %v2678_v27, %s1962_s8  ;;  %1274 = vrot.lane.b32.xlu0 %v1247_v45, %s1962_s8  ;;  %v1448_v54 = vrot.slane %v1447_v3, 4 }
  0xed   : > { %v1120_v34 = vpop.permute.xlu1 %1119  ;;  %v1118_v0 = vpop.permute.xlu0 %1117  ;;  %v1453_v1 = vsel %vm2170_vm13, %v1448_v54, %v1452_v40 }
  0xee   : > { %1143 = vst.msk [vmem:[#allocation2 + $0x4] sm:$0xf] %vm1141_vm15, %v1120_v34  ;;  %1142 = vst.msk [vmem:[#allocation2] sm:$0xf] %vm1141_vm15, %v1118_v0 }
  0xef   : > { %1417 = vrot.lane.b32.xlu1 %v1378_v7, %s1963_s9  ;;  %1415 = vrot.lane.b32.xlu0 %v2565_v23, %s1963_s9  ;;  %v1490_v23 = vrot.slane %v1488_v4, 4 }
  0xf1   : > { %v595_v16 = vpop.permute.xlu1 %594  ;;  %v593_v24 = vpop.permute.xlu0 %592  ;;  %v1494_v30 = vor.u32 %v1493_v18, %v1490_v23 }
  0xf2   : > { %612 = vst.msk [vmem:[#allocation2 + $0x1c] sm:$0xf] %vm604_vm10, %v595_v16  ;;  %611 = vst.msk [vmem:[#allocation2 + $0x18] sm:$0xf] %vm604_vm10, %v593_v24  ;;  %vm1286_vm10 = vcmask 421248  }
  0xf3   : > { %1421 = vrot.lane.b32.xlu1 %v1406_v14, %s1963_s9  ;;  %1419 = vrot.lane.b32.xlu0 %v1392_v61, %s1963_s9  ;;  %v1495_v62 = vrot.slane %v1494_v30, 4 }
  0xf5   : > { %v632_v22 = vpop.permute.xlu1 %631  ;;  %v630_v6 = vpop.permute.xlu0 %629  ;;  %v1500_v63 = vsel %vm2170_vm13, %v1495_v62, %v1499_v13  ;;  %vm1431_vm13 = vcmask 454048  }
  0xf6   : > { %651 = vst.msk [vmem:[#allocation2 + $0x14] sm:$0xf] %vm645_vm14, %v632_v22  ;;  %650 = vst.msk [vmem:[#allocation2 + $0x10] sm:$0xf] %vm645_vm14, %v630_v6 }
  0xf7   : > { %1464 = vrot.lane.b32.xlu1 %v1247_v45, %s1964_s10  ;;  %1462 = vrot.lane.b32.xlu0 %v2665_v32, %s1964_s10 }
  0xf9   : > { %v1124_v35 = vpop.permute.xlu1 %1123  ;;  %v1122_v36 = vpop.permute.xlu0 %1121 }
  0xfa   : > { %1145 = vst.msk [vmem:[#allocation2 + $0xc] sm:$0xf] %vm1141_vm15, %v1124_v35  ;;  %1144 = vst.msk [vmem:[#allocation2 + $0x8] sm:$0xf] %vm1141_vm15, %v1122_v36 }
  0xfb   : > { %1468 = vrot.lane.b32.xlu1 %v1453_v1, %s1964_s10  ;;  %1466 = vrot.lane.b32.xlu0 %v2678_v27, %s1964_s10 }
  0xfd   : > { %v1265_v37 = vpop.permute.xlu1 %1264  ;;  %v1263_v38 = vpop.permute.xlu0 %1262 }
  0xfe   : > { %1288 = vst.msk [vmem:[#allocation2 + $0x4] sm:$0xf] %vm1286_vm10, %v1265_v37  ;;  %1287 = vst.msk [vmem:[#allocation2] sm:$0xf] %vm1286_vm10, %v1263_v38 }
  0xff   : > { %1511 = vrot.lane.b32.xlu1 %v1392_v61, %s1965_s17  ;;  %1509 = vrot.lane.b32.xlu0 %v1378_v7, %s1965_s17 }
 0x101   : > { %v636_v19 = vpop.permute.xlu1 %635  ;;  %v634_v11 = vpop.permute.xlu0 %633 }
 0x102   : > { %653 = vst.msk [vmem:[#allocation2 + $0x1c] sm:$0xf] %vm645_vm14, %v636_v19  ;;  %652 = vst.msk [vmem:[#allocation2 + $0x18] sm:$0xf] %vm645_vm14, %v634_v11  ;;  %vm1478_vm14 = vcmask 486848  }
 0x103   : > { %1515 = vrot.lane.b32.xlu1 %v1500_v63, %s1965_s17  ;;  %1513 = vrot.lane.b32.xlu0 %v1406_v14, %s1965_s17 }
 0x105   : > { %v673_v41 = vpop.permute.xlu1 %672  ;;  %v671_v12 = vpop.permute.xlu0 %670 }
 0x106   : > { %692 = vst.msk [vmem:[#allocation2 + $0x14] sm:$0xf] %vm686_vm1, %v673_v41  ;;  %691 = vst.msk [vmem:[#allocation2 + $0x10] sm:$0xf] %vm686_vm1, %v671_v12 }
 0x109   : > { %v1269_v32 = vpop.permute.xlu1 %1268  ;;  %v1267_v43 = vpop.permute.xlu0 %1266 }
 0x10a   : > { %1290 = vst.msk [vmem:[#allocation2 + $0xc] sm:$0xf] %vm1286_vm10, %v1269_v32  ;;  %1289 = vst.msk [vmem:[#allocation2 + $0x8] sm:$0xf] %vm1286_vm10, %v1267_v43 }
 0x10d   : > { %v1410_v55 = vpop.permute.xlu1 %1409  ;;  %v1408_v56 = vpop.permute.xlu0 %1407 }
 0x10e   : > { %1433 = vst.msk [vmem:[#allocation2 + $0x4] sm:$0xf] %vm1431_vm13, %v1410_v55  ;;  %1432 = vst.msk [vmem:[#allocation2] sm:$0xf] %vm1431_vm13, %v1408_v56 }
 0x111   : > { %v677_v59 = vpop.permute.xlu1 %676  ;;  %v675_v44 = vpop.permute.xlu0 %674 }
 0x112   : > { %694 = vst.msk [vmem:[#allocation2 + $0x1c] sm:$0xf] %vm686_vm1, %v677_v59  ;;  %693 = vst.msk [vmem:[#allocation2 + $0x18] sm:$0xf] %vm686_vm1, %v675_v44  ;;  %vm1525_vm1 = vcmask 519648  }
 0x115   : > { %v707_v51 = vpop.permute.xlu1 %706  ;;  %v705_v52 = vpop.permute.xlu0 %704 }
 0x116   : > { %726 = vst.msk [vmem:[#allocation2 + $0x14] sm:$0xf] %vm720_vm3, %v707_v51  ;;  %725 = vst.msk [vmem:[#allocation2 + $0x10] sm:$0xf] %vm720_vm3, %v705_v52 }
 0x119   : > { %v1414_v20 = vpop.permute.xlu1 %1413  ;;  %v1412_v49 = vpop.permute.xlu0 %1411 }
 0x11a   : > { %1435 = vst.msk [vmem:[#allocation2 + $0xc] sm:$0xf] %vm1431_vm13, %v1414_v20  ;;  %1434 = vst.msk [vmem:[#allocation2 + $0x8] sm:$0xf] %vm1431_vm13, %v1412_v49 }
 0x11d   : > { %v1457_v28 = vpop.permute.xlu1 %1456  ;;  %v1455_v25 = vpop.permute.xlu0 %1454 }
 0x11e   : > { %1480 = vst.msk [vmem:[#allocation2 + $0x4] sm:$0xf] %vm1478_vm14, %v1457_v28  ;;  %1479 = vst.msk [vmem:[#allocation2] sm:$0xf] %vm1478_vm14, %v1455_v25 }
 0x121   : > { %v711_v27 = vpop.permute.xlu1 %710  ;;  %v709_v53 = vpop.permute.xlu0 %708 }
 0x122   : > { %728 = vst.msk [vmem:[#allocation2 + $0x1c] sm:$0xf] %vm720_vm3, %v711_v27  ;;  %727 = vst.msk [vmem:[#allocation2 + $0x18] sm:$0xf] %vm720_vm3, %v709_v53  ;;  %vm1594_vm3 = vcmask 523264  }
 0x125   : > { %v741_v57 = vpop.permute.xlu1 %740  ;;  %v739_v8 = vpop.permute.xlu0 %738 }
 0x126   : > { %760 = vst.msk [vmem:[#allocation2 + $0x14] sm:$0xf] %vm754_vm6, %v741_v57  ;;  %759 = vst.msk [vmem:[#allocation2 + $0x10] sm:$0xf] %vm754_vm6, %v739_v8 }
 0x129   : > { %v1461_v45 = vpop.permute.xlu1 %1460  ;;  %v1459_v58 = vpop.permute.xlu0 %1458 }
 0x12a   : > { %1482 = vst.msk [vmem:[#allocation2 + $0xc] sm:$0xf] %vm1478_vm14, %v1461_v45  ;;  %1481 = vst.msk [vmem:[#allocation2 + $0x8] sm:$0xf] %vm1478_vm14, %v1459_v58 }
 0x12d   : > { %v1504_v33 = vpop.permute.xlu1 %1503  ;;  %v1502_v50 = vpop.permute.xlu0 %1501 }
 0x12e   : > { %1527 = vst.msk [vmem:[#allocation2 + $0x4] sm:$0xf] %vm1525_vm1, %v1504_v33  ;;  %1526 = vst.msk [vmem:[#allocation2] sm:$0xf] %vm1525_vm1, %v1502_v50 }
 0x131   : > { %v745_v15 = vpop.permute.xlu1 %744  ;;  %v743_v42 = vpop.permute.xlu0 %742 }
 0x132   : > { %762 = vst.msk [vmem:[#allocation2 + $0x1c] sm:$0xf] %vm754_vm6, %v745_v15  ;;  %761 = vst.msk [vmem:[#allocation2 + $0x18] sm:$0xf] %vm754_vm6, %v743_v42  ;;  %vm1672_vm6 = vcmask 130048  }
 0x135   : > { %v889_v10 = vpop.permute.xlu1 %888  ;;  %v887_v21 = vpop.permute.xlu0 %886  ;;  %v1935_v39 = vld [vmem:[#allocation2] sm:$0xff]  }
 0x136   : > { %908 = vst.msk [vmem:[#allocation2 + $0x14] sm:$0xf] %vm902_vm0, %v889_v10  ;;  %907 = vst.msk [vmem:[#allocation2 + $0x10] sm:$0xf] %vm902_vm0, %v887_v21  ;;  %1889 = vmatprep.mubr.msk.bf16.mxu0 %vm1594_vm3, %v1935_v39 }
 0x139   : > { %v1508_v60 = vpop.permute.xlu1 %1507  ;;  %v1506_v7 = vpop.permute.xlu0 %1505 }
 0x13a   : > { %1529 = vst.msk [vmem:[#allocation2 + $0xc] sm:$0xf] %vm1525_vm1, %v1508_v60  ;;  %1528 = vst.msk [vmem:[#allocation2 + $0x8] sm:$0xf] %vm1525_vm1, %v1506_v7 }
 0x13d   : > { %v893_v46 = vpop.permute.xlu1 %892  ;;  %v891_v17 = vpop.permute.xlu0 %890 }
 0x13e   : > { %910 = vst.msk [vmem:[#allocation2 + $0x1c] sm:$0xf] %vm902_vm0, %v893_v46  ;;  %909 = vst.msk [vmem:[#allocation2 + $0x18] sm:$0xf] %vm902_vm0, %v891_v17  ;;  %vm1761_vm0 = vcmask 261248  }
 0x141   : > { %v1034_v26 = vpop.permute.xlu1 %1033  ;;  %v1032_v34 = vpop.permute.xlu0 %1031  ;;  %v1938_v0 = vld [vmem:[#allocation2 + $0x8] sm:$0xff]  }
 0x142   : > { %1053 = vst.msk [vmem:[#allocation2 + $0x14] sm:$0xf] %vm1047_vm8, %v1034_v26  ;;  %1052 = vst.msk [vmem:[#allocation2 + $0x10] sm:$0xf] %vm1047_vm8, %v1032_v34  ;;  %1890 = vmatmul.mubr.msk.bf16.vlgmr.msra.gmra.mrb[0].mxu0 %vm1594_vm3, %v1938_v0 }
 0x145   : > { %v1038_v2 = vpop.permute.xlu1 %1037  ;;  %v1036_v9 = vpop.permute.xlu0 %1035 }
 0x146   : > { %1055 = vst.msk [vmem:[#allocation2 + $0x1c] sm:$0xf] %vm1047_vm8, %v1038_v2  ;;  %1054 = vst.msk [vmem:[#allocation2 + $0x18] sm:$0xf] %vm1047_vm8, %v1036_v9  ;;  %vm1767_vm8 = vcmask 392448  }
 0x149   : > { %v1081_v3 = vpop.permute.xlu1 %1080  ;;  %v1079_v4 = vpop.permute.xlu0 %1078 }
 0x14a   : > { %1100 = vst.msk [vmem:[#allocation2 + $0x14] sm:$0xf] %vm1094_vm2, %v1081_v3  ;;  %1099 = vst.msk [vmem:[#allocation2 + $0x10] sm:$0xf] %vm1094_vm2, %v1079_v4 }
 0x14d   : > { %v1085_v48 = vpop.permute.xlu1 %1084  ;;  %v1083_v14 = vpop.permute.xlu0 %1082 }
 0x14e   : > { %1102 = vst.msk [vmem:[#allocation2 + $0x1c] sm:$0xf] %vm1094_vm2, %v1085_v48  ;;  %1101 = vst.msk [vmem:[#allocation2 + $0x18] sm:$0xf] %vm1094_vm2, %v1083_v14  ;;  %vm1779_vm2 = vcmask 654848  }
 0x151   : > { %v1128_v61 = vpop.permute.xlu1 %1127  ;;  %v1126_v47 = vpop.permute.xlu0 %1125 }
 0x152   : > { %1147 = vst.msk [vmem:[#allocation2 + $0x14] sm:$0xf] %vm1141_vm15, %v1128_v61  ;;  %1146 = vst.msk [vmem:[#allocation2 + $0x10] sm:$0xf] %vm1141_vm15, %v1126_v47 }
 0x155   : > { %v1132_v16 = vpop.permute.xlu1 %1131  ;;  %v1130_v24 = vpop.permute.xlu0 %1129 }
 0x156   : > { %1149 = vst.msk [vmem:[#allocation2 + $0x1c] sm:$0xf] %vm1141_vm15, %v1132_v16  ;;  %1148 = vst.msk [vmem:[#allocation2 + $0x18] sm:$0xf] %vm1141_vm15, %v1130_v24 }
 0x159   : > { %v1273_v5 = vpop.permute.xlu1 %1272  ;;  %v1271_v54 = vpop.permute.xlu0 %1270 }
 0x15a   : > { %1292 = vst.msk [vmem:[#allocation2 + $0x14] sm:$0xf] %vm1286_vm10, %v1273_v5  ;;  %1291 = vst.msk [vmem:[#allocation2 + $0x10] sm:$0xf] %vm1286_vm10, %v1271_v54 }
 0x15d   : > { %v1277_v23 = vpop.permute.xlu1 %1276  ;;  %v1275_v18 = vpop.permute.xlu0 %1274 }
 0x15e   : > { %1294 = vst.msk [vmem:[#allocation2 + $0x1c] sm:$0xf] %vm1286_vm10, %v1277_v23  ;;  %1293 = vst.msk [vmem:[#allocation2 + $0x18] sm:$0xf] %vm1286_vm10, %v1275_v18 }
 0x161   : > { %v1418_v40 = vpop.permute.xlu1 %1417  ;;  %v1416_v22 = vpop.permute.xlu0 %1415 }
 0x162   : > { %1437 = vst.msk [vmem:[#allocation2 + $0x14] sm:$0xf] %vm1431_vm13, %v1418_v40  ;;  %1436 = vst.msk [vmem:[#allocation2 + $0x10] sm:$0xf] %vm1431_vm13, %v1416_v22 }
 0x165   : > { %v1422_v6 = vpop.permute.xlu1 %1421  ;;  %v1420_v29 = vpop.permute.xlu0 %1419 }
 0x166   : > { %1439 = vst.msk [vmem:[#allocation2 + $0x1c] sm:$0xf] %vm1431_vm13, %v1422_v6  ;;  %1438 = vst.msk [vmem:[#allocation2 + $0x18] sm:$0xf] %vm1431_vm13, %v1420_v29 }
 0x169   : > { %v1465_v30 = vpop.permute.xlu1 %1464  ;;  %v1463_v1 = vpop.permute.xlu0 %1462 }
 0x16a   : > { %1484 = vst.msk [vmem:[#allocation2 + $0x14] sm:$0xf] %vm1478_vm14, %v1465_v30  ;;  %1483 = vst.msk [vmem:[#allocation2 + $0x10] sm:$0xf] %vm1478_vm14, %v1463_v1 }
 0x16d   : > { %v1469_v31 = vpop.permute.xlu1 %1468  ;;  %v1467_v35 = vpop.permute.xlu0 %1466 }
 0x16e   : > { %1486 = vst.msk [vmem:[#allocation2 + $0x1c] sm:$0xf] %vm1478_vm14, %v1469_v31  ;;  %1485 = vst.msk [vmem:[#allocation2 + $0x18] sm:$0xf] %vm1478_vm14, %v1467_v35 }
 0x171   : > { %v1512_v36 = vpop.permute.xlu1 %1511  ;;  %v1510_v62 = vpop.permute.xlu0 %1509 }
 0x172   : > { %1531 = vst.msk [vmem:[#allocation2 + $0x14] sm:$0xf] %vm1525_vm1, %v1512_v36  ;;  %1530 = vst.msk [vmem:[#allocation2 + $0x10] sm:$0xf] %vm1525_vm1, %v1510_v62 }
 0x175   : > { %v1516_v13 = vpop.permute.xlu1 %1515  ;;  %v1514_v37 = vpop.permute.xlu0 %1513 }
 0x176   : > { %1533 = vst.msk [vmem:[#allocation2 + $0x1c] sm:$0xf] %vm1525_vm1, %v1516_v13  ;;  %1532 = vst.msk [vmem:[#allocation2 + $0x18] sm:$0xf] %vm1525_vm1, %v1514_v37 }
 0x179   : > { %v1939_v38 = vld [vmem:[#allocation2 + $0x10] sm:$0xff]  }
 0x17a   : > { %1893 = vmatprep.mubr.msk.bf16.mxu1 %vm1594_vm3, %v1939_v38 }
 0x17d   : > { %v1940_v63 = vld [vmem:[#allocation2 + $0x18] sm:$0xff]  }
 0x17e   : > { %1894 = vmatmul.mubr.msk.bf16.vlgmr.msra.gmra.mrb[0].mxu1 %vm1594_vm3, %v1940_v63 }
 0x215   : > { %v2789_v19 = vpop.f32.mrb[0].mxu0 }
 0x216   : > { %v2791_v11 = vpop.f32.mrb[1].mxu0  ;;  %v1698_v43 = vmul.f32 %v2789_v19, %v2789_v19  ;;  %v1676_v51 = vsel %vm1672_vm6, %v2789_v19, 0.0 }
 0x217   : > { %v1696_v41 = vmul.f32 %v2791_v11, %v2791_v11  ;;  %v2795_v12 = vpop.f32.mrb[2].mxu0  ;;  %v1673_v55 = vsel %vm1672_vm6, %v2791_v11, 0.0 }
 0x218   : > { %v2797_v32 = vpop.f32.mrb[3].mxu0  ;;  %v1699_v20 = vmul.f32 %v2795_v12, %v2795_v12  ;;  %v1707_v27 = vsel %vm1672_vm6, %v1698_v43, 0.0  ;;  %v1678_v53 = vsel %vm1672_vm6, %v2795_v12, 0.0  ;;  %v1734_v43 = vstv %s1733_s3 }
 0x219   : > { %v1674_v56 = vsel %vm1672_vm6, %v2797_v32, 0.0  ;;  %v1697_v59 = vmul.f32 %v2797_v32, %v2797_v32  ;;  %v1704_v52 = vsel %vm1672_vm6, %v1696_v41, 0.0 }
 0x21a   : > { %v1675_v44 = vadd.f32 %v1674_v56, %v1673_v55  ;;  %v1709_v45 = vsel %vm1672_vm6, %v1699_v20, 0.0 }
 0x21b   : > { %v1705_v49 = vsel %vm1672_vm6, %v1697_v59, 0.0  ;;  %v1738_v59 = vstv %s1736_s21 }
 0x21c   : > { %v1677_v28 = vadd.f32 %v1676_v51, %v1675_v44  ;;  %v1706_v25 = vadd.f32 %v1705_v49, %v1704_v52 }
 0x21e   : > { %v1708_v57 = vadd.f32 %v1707_v27, %v1706_v25  ;;  %v1679_v8 = vadd.f32 %v1678_v53, %v1677_v28 }
 0x220   : > { %v1710_v58 = vadd.f32 %v1709_v45, %v1708_v57 }
 0x251   : > { %v2817_v33 = vpop.f32.mrb[0].mxu1 }
 0x252   : > { %v2819_v50 = vpop.f32.mrb[1].mxu1  ;;  %v1702_v60 = vmul.f32 %v2817_v33, %v2817_v33  ;;  %v1684_v0 = vsel %vm1672_vm6, %v2817_v33, 0.0 }
 0x253   : > { %v1680_v15 = vsel %vm1672_vm6, %v2819_v50, 0.0  ;;  %v1700_v42 = vmul.f32 %v2819_v50, %v2819_v50  ;;  %v2825_v10 = vpop.f32.mrb[2].mxu1 }
 0x254   : > { %v1681_v21 = vadd.f32 %v1680_v15, %v1679_v8  ;;  %v2827_v39 = vpop.f32.mrb[3].mxu1  ;;  %v1703_v2 = vmul.f32 %v2825_v10, %v2825_v10  ;;  %v1715_v48 = vsel %vm1672_vm6, %v1702_v60, 0.0  ;;  %v1686_v14 = vsel %vm1672_vm6, %v2825_v10, 0.0 }
 0x255   : > { %v1711_v7 = vsel %vm1672_vm6, %v1700_v42, 0.0  ;;  %v1682_v46 = vsel %vm1672_vm6, %v2827_v39, 0.0  ;;  %v1701_v17 = vmul.f32 %v2827_v39, %v2827_v39 }
 0x256   : > { %v1712_v26 = vadd.f32 %v1711_v7, %v1710_v58  ;;  %v1683_v34 = vadd.f32 %v1682_v46, %v1681_v21  ;;  %v1717_v16 = vsel %vm1672_vm6, %v1703_v2, 0.0 }
 0x257   : > { %v1713_v9 = vsel %vm1672_vm6, %v1701_v17, 0.0 }
 0x258   : > { %v1685_v3 = vadd.f32 %v1684_v0, %v1683_v34  ;;  %v1714_v4 = vadd.f32 %v1713_v9, %v1712_v26 }
 0x25a   : > { %v1687_v61 = vadd.f32 %v1686_v14, %v1685_v3  ;;  %v1716_v47 = vadd.f32 %v1715_v48, %v1714_v4 }
 0x25c   : > { %1688 = vadd.xlane.f32.xlu0 %v1687_v61  ;;  %v1718_v24 = vadd.f32 %v1717_v16, %v1716_v47 }
 0x25e   : > { %1719 = vadd.xlane.f32.xlu1 %v1718_v24 }
 0x2e9   : > { %v1689_v5 = vpop.xlane.xlu0 %1688 }
 0x2ea   : > { %v1690_v54 = vrot.slane %v1689_v5, 4 }
 0x2eb   : > { %v1720_v23 = vpop.xlane.xlu1 %1719 }
 0x2ec   : > { %v1691_v18 = vadd.f32 %v1690_v54, %v1689_v5  ;;  %v1721_v40 = vrot.slane %v1720_v23, 4 }
 0x2ee   : > { %v1692_v22 = vrot.slane %v1691_v18, 2  ;;  %v1722_v6 = vadd.f32 %v1721_v40, %v1720_v23 }
 0x2f0   : > { %v1693_v29 = vadd.f32 %v1692_v22, %v1691_v18  ;;  %v1723_v30 = vrot.slane %v1722_v6, 2 }
 0x2f2   : > { %v1694_v1 = vrot.slane %v1693_v29, 1  ;;  %v1724_v31 = vadd.f32 %v1723_v30, %v1722_v6 }
 0x2f4   : > { %v1695_v35 = vadd.f32 %v1694_v1, %v1693_v29  ;;  %v1725_v36 = vrot.slane %v1724_v31, 1 }
 0x2f6   : > { %v1727_v62 = vmul.f32 0.0009765625, %v1695_v35  ;;  %v1726_v13 = vadd.f32 %v1725_v36, %v1724_v31 }
 0x2f8   : > { %v1729_v37 = vmul.f32 %v1727_v62, %v1727_v62  ;;  %v1728_v38 = vmul.f32 0.0009765625, %v1726_v13 }
 0x2fa   : > { %v1730_v63 = vsub.f32 %v1728_v38, %v1729_v37 }
 0x2fc   : > { %v1731_v41 = vadd.f32 0.001, %v1730_v63 }
 0x2fe   : > { %1941 = vrsqrt.f32 %v1731_v41 }
 0x308   : > { %v1942_v55 = vpop.eup %1941 }
 0x309   : > { %v1735_v56 = vmul.f32 %v1942_v55, %v1734_v43 }
 0x30b   : > { %v1737_v44 = vmul.f32 %v1735_v56, %v1727_v62  ;;  %v1742_v52 = vmul.f32 %v2789_v19, %v1735_v56  ;;  %v1741_v20 = vmul.f32 %v1735_v56, %v2797_v32  ;;  %v1740_v49 = vmul.f32 %v1735_v56, %v2791_v11 }
 0x30c   : > { %v1744_v53 = vmul.f32 %v1735_v56, %v2819_v50  ;;  %v1743_v19 = vmul.f32 %v2795_v12, %v1735_v56  ;;  %v1746_v57 = vmul.f32 %v2817_v33, %v1735_v56  ;;  %v1745_v8 = vmul.f32 %v1735_v56, %v2827_v39 }
 0x30d   : > { %v1739_v51 = vsub.f32 %v1738_v59, %v1737_v44  ;;  %v1747_v12 = vmul.f32 %v2825_v10, %v1735_v56 }
 0x30f   : > { %v1750_v28 = vadd.f32 %v1742_v52, %v1739_v51  ;;  %v1749_v25 = vadd.f32 %v1741_v20, %v1739_v51  ;;  %v1748_v27 = vadd.f32 %v1740_v49, %v1739_v51  ;;  %v1752_v11 = vadd.f32 %v1744_v53, %v1739_v51 }
 0x310   : > { %v1751_v32 = vadd.f32 %v1743_v19, %v1739_v51  ;;  %v1754_v45 = vadd.f32 %v1746_v57, %v1739_v51  ;;  %v1753_v58 = vadd.f32 %v1745_v8, %v1739_v51  ;;  %v1755_v50 = vadd.f32 %v1747_v12, %v1739_v51 }
 0x311   : > { %1764 = vrot.lane.b32.xlu1 %v1750_v28, %s1958_s30  ;;  %1758 = vrot.lane.b32.xlu0 %v1749_v25, %s1954_s26  ;;  %1756 = vst.msk [vmem:[%s2852_s25] sm:$0xff] %vm1672_vm6, %v1748_v27  ;;  %s1967_s26 = smov 96  }
 0x315   : > { %1776 = vrot.lane.b32.xlu1 %v1752_v11, %s1966_s20  ;;  %1770 = vrot.lane.b32.xlu0 %v1751_v32, %s1962_s8 }
 0x319   : > { %1788 = vrot.lane.b32.xlu1 %v1754_v45, %s1967_s26  ;;  %1782 = vrot.lane.b32.xlu0 %v1753_v58, %s1968_s27 }
 0x31d   : > { %1794 = vrot.lane.b32.xlu0 %v1755_v50, %s1969_s28 }
 0x383   : > { %v1765_v33 = vpop.permute.xlu1 %1764  ;;  %v1759_v15 = vpop.permute.xlu0 %1758 }
 0x384   : > { %1762 = vst.msk [vmem:[%s2852_s25] sm:$0xff] %vm1761_vm0, %v1759_v15 }
 0x385   : > { %1768 = vst.msk [vmem:[%s2852_s25] sm:$0xff] %vm1767_vm8, %v1765_v33 }
 0x387   : > { %v1777_v42 = vpop.permute.xlu1 %1776  ;;  %v1771_v21 = vpop.permute.xlu0 %1770 }
 0x388   : > { %1774 = vst.msk [vmem:[%s2852_s25] sm:$0xff] %vm1773_vm12, %v1771_v21 }
 0x389   : > { %1780 = vst.msk [vmem:[%s2852_s25] sm:$0xff] %vm1779_vm2, %v1777_v42 }
 0x38b   : > { %v1789_v10 = vpop.permute.xlu1 %1788  ;;  %v1783_v39 = vpop.permute.xlu0 %1782 }
 0x38c   : > { %1786 = vst.msk [vmem:[%s2852_s25] sm:$0xff] %vm1785_vm4, %v1783_v39 }
 0x38d   : > { %1792 = vst.msk [vmem:[%s2852_s25] sm:$0xff] %vm1791_vm5, %v1789_v10 }
 0x38f   : > { %v1795_v60 = vpop.permute.xlu0 %1794 }
 0x390   : > { %1798 = vst.msk [vmem:[%s2852_s25] sm:$0xff] %vm1797_vm9, %v1795_v60 }
 0x391 PF: > { %s16_s19 = sadd.s32 1, %s1949_s19  }
 0x392   : > { %p13_p4 = scmp.ge.s32.totalorder %s16_s19, 4  }
 0x394   :  { %15 = sbr.rel (!%p13_p4) target bundleno = 3 (0x3), region = 66 }

</bundles_post_ra>
